<compile_context>
chip_gen: v5e
topology: v5e:2x2
jax: 0.10.0
libtpu: 0.0.40
codegen_flags: <defaults>
</compile_context>

<pallas_src>
import functools

import jax
import jax.numpy as jnp
from jax.experimental import pallas as pl
from jax.experimental.pallas import tpu as pltpu

# ----------------------------- config (cfg dict of the PyTorch module) -------
CFG = dict(
    lr=1e-3,
    epochs=1,
    max_features=50,
    batch_size=2,
    hidden_size=32,
    embedding_dim=16,
    num_layers=1,       # init_hidden() in the reference hardcodes 1 layer
    num_class=4,
)
SEQ_LEN = 8
LANE = 128
SUBLANE = 8


def _round_up(x, m):
    return (x + m - 1) // m * m


# ----------------------------- Pallas kernel ---------------------------------
def gru_linear_kernel(x_ref, h0_ref, wih_ref, whh_ref, bi_ref, bhn_ref,
                      wlin_ref, blin_ref, logits_ref, hout_ref, gi_ref):
    """Whole forward (input proj + GRU recurrence + final Linear) in one call.

    x_ref    : (S*Bp, E)  embedded tokens, time-major rows (row = t*Bp + b)
    h0_ref   : (Bp, Hp)   initial hidden, batch padded to 8, lanes to 128
    wih_ref  : (E, 3*Hp)  per-gate transposed W_ih, gate outputs lane-padded
    whh_ref  : (H, 3*Hp)  per-gate transposed W_hh, K dim NOT padded
    bi_ref   : (1, 3*Hp)  folded biases [b_ir+b_hr, b_iz+b_hz, b_in]
    bhn_ref  : (1, Hp)    b_hn (kept separate for the r*(h@W_hn + b_hn) term)
    wlin_ref : (H, Cp)    transposed Linear weight, K dim NOT padded
    blin_ref : (1, Cp)
    logits_ref : (Bp, Cp) lane-dense logits (valid rows [:B], cols [:C])
    hout_ref   : (Bp, Hp) lane-dense final hidden (valid rows [:B], cols [:H])
    gi_ref     : (S*Bp, 3*Hp) VMEM scratch for the hoisted input projection
    """
    Bp, Hp = h0_ref.shape
    S = x_ref.shape[0] // Bp
    H = whh_ref.shape[0]          # true hidden width (contraction size)

    # Hoisted input projection: one MXU dispatch covers every timestep, folded
    # biases added once.  Stored to VMEM scratch so only the per-step slice is
    # live in vregs during the serial recurrence.
    gi_ref[...] = (jnp.dot(x_ref[...], wih_ref[...],
                           preferred_element_type=jnp.float32)
                   + bi_ref[...])                               # (S*Bp, 3*Hp)

    bhn = bhn_ref[...]            # (1, Hp), one vreg, hoisted
    h = h0_ref[...]               # (Bp, Hp); padded lanes are exactly 0

    # Fully unrolled serial recurrence (S is a small static constant).  Only
    # the h-dependent K=32 matmul + gate math remain on the critical path; all
    # gate slices are 128-lane / 8-sublane aligned.
    for t in range(S):
        gi = gi_ref[t * Bp:(t + 1) * Bp, :]                     # (Bp, 3*Hp)
        gh = jnp.dot(h[:, :H], whh_ref[...],                    # W_hh streamed
                     preferred_element_type=jnp.float32)        # (Bp, 3*Hp)
        rz = jax.nn.sigmoid(gi[:, :2 * Hp] + gh[:, :2 * Hp])    # fused r,z
        r = rz[:, :Hp]
        z = rz[:, Hp:2 * Hp]
        n = jnp.tanh(gi[:, 2 * Hp:] + r * (gh[:, 2 * Hp:] + bhn))
        h = (1.0 - z) * n + z * h
        # Padded lanes stay exactly 0: gi/gh/bhn pads are 0 -> n_pad = 0,
        # z_pad = 0.5, so h_pad' = 0.5 * h_pad = 0 every step.

    logits_ref[...] = (jnp.dot(h[:, :H], wlin_ref[...],
                               preferred_element_type=jnp.float32)
                       + blin_ref[...])
    hout_ref[...] = h


# ----------------------------- one-time weight packing ------------------------
def prepare_params(params):
    """Pack/pad weights ONCE; keeps ~15 transpose/pad/concat ops off the
    per-call hot path."""
    emb, w_ih, w_hh, b_ih, b_hh, w_lin, b_lin = params
    E = emb.shape[1]
    H = w_hh.shape[1]
    C = w_lin.shape[0]
    Hp = _round_up(H, LANE)
    Cp = _round_up(C, LANE)

    def pack_gates(w):
        # (3H, in_dim) -> (in_dim, 3*Hp): per-gate transpose; each gate's
        # OUTPUT block zero-padded to its own 128-lane slot.  The contraction
        # (K) dim is left unpadded.
        blocks = []
        for g in range(3):
            wg = w[g * H:(g + 1) * H, :].T                     # (in_dim, H)
            blocks.append(jnp.pad(wg, ((0, 0), (0, Hp - H))))
        return jnp.concatenate(blocks, axis=1)

    def pad_lane(v, width):
        return jnp.pad(v, (0, width - v.shape[0]))

    wih_p = pack_gates(w_ih)                                   # (E, 3*Hp)
    whh_p = pack_gates(w_hh)                                   # (H, 3*Hp)

    # Fold b_hh into b_ih for r/z gates; keep b_hh_n separate (n gate).
    bi_p = jnp.concatenate([
        pad_lane(b_ih[0:H] + b_hh[0:H], Hp),
        pad_lane(b_ih[H:2 * H] + b_hh[H:2 * H], Hp),
        pad_lane(b_ih[2 * H:3 * H], Hp),
    ])[None, :]                                                # (1, 3*Hp)
    bhn_p = pad_lane(b_hh[2 * H:3 * H], Hp)[None, :]           # (1, Hp)

    wlin_p = jnp.pad(w_lin.T, ((0, 0), (0, Cp - C)))           # (H, Cp)
    blin_p = pad_lane(b_lin, Cp)[None, :]                      # (1, Cp)

    return (emb.astype(jnp.float32), wih_p, whh_p, bi_p, bhn_p, wlin_p, blin_p)


# ----------------------------- per-call forward --------------------------------
@functools.partial(jax.jit, static_argnames=("num_class",))
def basenet_forward(x_ids, h0, packed, *, num_class):
    """Pallas-backed equivalent of BaseNet.forward(x, h) -> (logits, h_n)."""
    emb, wih_p, whh_p, bi_p, bhn_p, wlin_p, blin_p = packed
    S, B = x_ids.shape
    E = emb.shape[1]
    H = whh_p.shape[0]
    Hp = bhn_p.shape[1]
    Cp = wlin_p.shape[1]
    C = num_class
    Bp = _round_up(B, SUBLANE)

    # Per-call glue is minimal: pad ids to 8 sublanes (padded rows gather
    # emb[0]; their outputs are sliced away), gather embeddings time-major
    # (row = t*Bp + b), pad h0.
    ids_p = jnp.pad(x_ids, ((0, 0), (0, Bp - B)))
    x_emb = jnp.take(emb, ids_p.reshape(-1), axis=0)           # (S*Bp, E)
    h0_p = jnp.pad(h0[0], ((0, Bp - B), (0, Hp - H)))          # (Bp, Hp)

    grid_spec = pltpu.PrefetchScalarGridSpec(
        num_scalar_prefetch=0,
        grid=(1,),                                             # single step: whole problem in VMEM
        in_specs=[
            pl.BlockSpec((S * Bp, E), lambda i: (0, 0)),       # x_emb
            pl.BlockSpec((Bp, Hp), lambda i: (0, 0)),          # h0 (padded)
            pl.BlockSpec((E, 3 * Hp), lambda i: (0, 0)),       # W_ih packed
            pl.BlockSpec((H, 3 * Hp), lambda i: (0, 0)),       # W_hh packed (K=H)
            pl.BlockSpec((1, 3 * Hp), lambda i: (0, 0)),       # folded bias
            pl.BlockSpec((1, Hp), lambda i: (0, 0)),           # b_hn
            pl.BlockSpec((H, Cp), lambda i: (0, 0)),           # W_lin packed (K=H)
            pl.BlockSpec((1, Cp), lambda i: (0, 0)),           # b_lin
        ],
        out_specs=[
            pl.BlockSpec((Bp, Cp), lambda i: (0, 0)),          # logits (whole tile)
            pl.BlockSpec((Bp, Hp), lambda i: (0, 0)),          # h_n   (whole tile)
        ],
        scratch_shapes=[pltpu.VMEM((S * Bp, 3 * Hp), jnp.float32)],
    )

    logits_p, hout_p = pl.pallas_call(
        gru_linear_kernel,
        out_shape=(jax.ShapeDtypeStruct((Bp, Cp), jnp.float32),
                   jax.ShapeDtypeStruct((Bp, Hp), jnp.float32)),
        grid_spec=grid_spec,
        compiler_params=pltpu.CompilerParams(
            dimension_semantics=("arbitrary",),
        ),
    )(x_emb, h0_p, wih_p, whh_p, bi_p, bhn_p, wlin_p, blin_p)

    logits = logits_p[:B, :C]
    h_n = hout_p[:B, :H][None]
    return logits, h_n


# ----------------------------- pure-JAX reference (for verification) ---------
def basenet_forward_ref(x_ids, h0, params):
    emb, w_ih, w_hh, b_ih, b_hh, w_lin, b_lin = params
    H = w_hh.shape[1]
    x_emb = jnp.take(emb, x_ids, axis=0).astype(jnp.float32)

    def step(h, x_t):
        gi = x_t @ w_ih.T + b_ih
        gh = h @ w_hh.T + b_hh
        i_r, i_z, i_n = gi[:, :H], gi[:, H:2 * H], gi[:, 2 * H:]
        h_r, h_z, h_n = gh[:, :H], gh[:, H:2 * H], gh[:, 2 * H:]
        r = jax.nn.sigmoid(i_r + h_r)
        z = jax.nn.sigmoid(i_z + h_z)
        n = jnp.tanh(i_n + r * h_n)
        h_new = (1.0 - z) * n + z * h
        return h_new, h_new

    h_last, _ = jax.lax.scan(step, h0[0], x_emb)
    logits = h_last @ w_lin.T + b_lin
    return logits, h_last[None]


# ----------------------------- deterministic parameter init ------------------
def init_params(key, cfg):
    V, E, H, C = (cfg['max_features'], cfg['embedding_dim'],
                  cfg['hidden_size'], cfg['num_class'])
    ks = jax.random.split(key, 7)
    bound = 1.0 / jnp.sqrt(H)
    emb = jax.random.normal(ks[0], (V, E), jnp.float32)
    w_ih = jax.random.uniform(ks[1], (3 * H, E), jnp.float32, -bound, bound)
    w_hh = jax.random.uniform(ks[2], (3 * H, H), jnp.float32, -bound, bound)
    b_ih = jax.random.uniform(ks[3], (3 * H,), jnp.float32, -bound, bound)
    b_hh = jax.random.uniform(ks[4], (3 * H,), jnp.float32, -bound, bound)
    w_lin = jax.random.uniform(ks[5], (C, H), jnp.float32, -bound, bound)
    b_lin = jax.random.uniform(ks[6], (C,), jnp.float32, -bound, bound)
    return (emb, w_ih, w_hh, b_ih, b_hh, w_lin, b_lin)


if __name__ == "__main__":
    key = jax.random.PRNGKey(0)
    k_param, k_x = jax.random.split(key)

    params = init_params(k_param, CFG)
    packed = prepare_params(params)          # one-time packing, off the hot path
    jax.block_until_ready(packed)

    B, H = CFG['batch_size'], CFG['hidden_size']

    # x: (seq_len, batch) token ids; h0: zeros like init_hidden().
    x_ids = jax.random.randint(k_x, (SEQ_LEN, B), 0, CFG['max_features'], jnp.int32)
    h0 = jnp.zeros((1, B, H), jnp.float32)

    logits, h_n = basenet_forward(x_ids, h0, packed, num_class=CFG['num_class'])
    jax.block_until_ready((logits, h_n))

    ref_logits, ref_h = basenet_forward_ref(x_ids, h0, params)
    assert logits.shape == (B, CFG['num_class'])
    assert h_n.shape == (1, B, H)
    assert jnp.allclose(logits, ref_logits, atol=1e-4, rtol=1e-4)
    assert jnp.allclose(h_n, ref_h, atol=1e-4, rtol=1e-4)

    print("KERNEL_OK")
</pallas_src>

<mosaic_0001>
module attributes {stable_mosaic.version = 11 : i64} {
  func.func @gru_linear_kernel(%arg0: i32, %arg1: memref<64x16xf32, #tpu.memory_space<vmem>>, %arg2: memref<8x128xf32, #tpu.memory_space<vmem>>, %arg3: memref<16x384xf32, #tpu.memory_space<vmem>>, %arg4: memref<32x384xf32, #tpu.memory_space<vmem>>, %arg5: memref<1x384xf32, #tpu.memory_space<vmem>>, %arg6: memref<1x128xf32, #tpu.memory_space<vmem>>, %arg7: memref<32x128xf32, #tpu.memory_space<vmem>>, %arg8: memref<1x128xf32, #tpu.memory_space<vmem>>, %arg9: memref<8x128xf32, #tpu.memory_space<vmem>>, %arg10: memref<8x128xf32, #tpu.memory_space<vmem>>, %arg11: memref<64x384xf32, #tpu.memory_space<vmem>>) attributes {dimension_semantics = [#tpu.dimension_semantics<arbitrary>], iteration_bounds = array<i64: 1>, scalar_prefetch = 0 : i64, scratch_operands = 1 : i64, tpu.core_type = #tpu.core_type<tc>, window_params = [{pipeline_mode = #tpu.pipeline_mode<synchronous>, transform_indices = @transform_0, window_bounds = array<i64: 64, 16>}, {pipeline_mode = #tpu.pipeline_mode<synchronous>, transform_indices = @transform_1, window_bounds = array<i64: 8, 128>}, {pipeline_mode = #tpu.pipeline_mode<synchronous>, transform_indices = @transform_2, window_bounds = array<i64: 16, 384>}, {pipeline_mode = #tpu.pipeline_mode<synchronous>, transform_indices = @transform_3, window_bounds = array<i64: 32, 384>}, {pipeline_mode = #tpu.pipeline_mode<synchronous>, transform_indices = @transform_4, window_bounds = array<i64: 1, 384>}, {pipeline_mode = #tpu.pipeline_mode<synchronous>, transform_indices = @transform_5, window_bounds = array<i64: 1, 128>}, {pipeline_mode = #tpu.pipeline_mode<synchronous>, transform_indices = @transform_6, window_bounds = array<i64: 32, 128>}, {pipeline_mode = #tpu.pipeline_mode<synchronous>, transform_indices = @transform_7, window_bounds = array<i64: 1, 128>}, {pipeline_mode = #tpu.pipeline_mode<synchronous>, transform_indices = @transform_8, window_bounds = array<i64: 8, 128>}, {pipeline_mode = #tpu.pipeline_mode<synchronous>, transform_indices = @transform_9, window_bounds = array<i64: 8, 128>}]} {
    %c0 = arith.constant 0 : index
    %c0_0 = arith.constant 0 : index
    %0 = vector.load %arg1[%c0, %c0_0] : memref<64x16xf32, #tpu.memory_space<vmem>>, vector<64x16xf32>
    %c0_1 = arith.constant 0 : index
    %c0_2 = arith.constant 0 : index
    %1 = vector.load %arg3[%c0_1, %c0_2] : memref<16x384xf32, #tpu.memory_space<vmem>>, vector<16x384xf32>
    %cst = arith.constant dense<0.000000e+00> : vector<64x384xf32>
    %2 = tpu.matmul %0, %1, %cst {dimension_numbers = #tpu.dot_dimension_numbers<[1], [0], [0], [1], [0, 0, 1, 1], [], []>} : vector<64x16xf32>, vector<16x384xf32>, vector<64x384xf32> -> vector<64x384xf32>
    %c0_3 = arith.constant 0 : index
    %c0_4 = arith.constant 0 : index
    %3 = vector.load %arg5[%c0_3, %c0_4] : memref<1x384xf32, #tpu.memory_space<vmem>>, vector<1x384xf32>
    %4 = vector.broadcast %3 : vector<1x384xf32> to vector<64x384xf32>
    %5 = arith.addf %2, %4 : vector<64x384xf32>
    %c0_5 = arith.constant 0 : index
    %c0_6 = arith.constant 0 : index
    %6 = vector.load %arg11[%c0_5, %c0_6] : memref<64x384xf32, #tpu.memory_space<vmem>>, vector<64x384xf32>
    tpu.vector_store %arg11[%c0_5, %c0_6], %5 {strides = array<i32>} : memref<64x384xf32, #tpu.memory_space<vmem>>, vector<64x384xf32>,
    %c0_7 = arith.constant 0 : index
    %c0_8 = arith.constant 0 : index
    %7 = vector.load %arg6[%c0_7, %c0_8] : memref<1x128xf32, #tpu.memory_space<vmem>>, vector<1x128xf32>
    %c0_9 = arith.constant 0 : index
    %c0_10 = arith.constant 0 : index
    %8 = vector.load %arg2[%c0_9, %c0_10] : memref<8x128xf32, #tpu.memory_space<vmem>>, vector<8x128xf32>
    %c0_11 = arith.constant 0 : index
    %c0_12 = arith.constant 0 : index
    %9 = vector.load %arg11[%c0_11, %c0_12] : memref<64x384xf32, #tpu.memory_space<vmem>>, vector<8x384xf32>
    %10 = vector.extract_strided_slice %8 {offsets = [0, 0], sizes = [8, 32], strides = [1, 1]} : vector<8x128xf32> to vector<8x32xf32>
    %c0_13 = arith.constant 0 : index
    %c0_14 = arith.constant 0 : index
    %11 = vector.load %arg4[%c0_13, %c0_14] : memref<32x384xf32, #tpu.memory_space<vmem>>, vector<32x384xf32>
    %cst_15 = arith.constant dense<0.000000e+00> : vector<8x384xf32>
    %12 = tpu.matmul %10, %11, %cst_15 {dimension_numbers = #tpu.dot_dimension_numbers<[1], [0], [0], [1], [0, 0, 1, 1], [], []>} : vector<8x32xf32>, vector<32x384xf32>, vector<8x384xf32> -> vector<8x384xf32>
    %13 = vector.extract_strided_slice %9 {offsets = [0, 0], sizes = [8, 256], strides = [1, 1]} : vector<8x384xf32> to vector<8x256xf32>
    %14 = vector.extract_strided_slice %12 {offsets = [0, 0], sizes = [8, 256], strides = [1, 1]} : vector<8x384xf32> to vector<8x256xf32>
    %15 = arith.addf %13, %14 : vector<8x256xf32>
    %16 = arith.negf %15 : vector<8x256xf32>
    %17 = math.exp %16 : vector<8x256xf32>
    %cst_16 = arith.constant 1.000000e+00 : f32
    %18 = vector.broadcast %cst_16 : f32 to vector<8x256xf32>
    %19 = arith.addf %18, %17 : vector<8x256xf32>
    %20 = arith.divf %18, %19 : vector<8x256xf32>
    %21 = vector.extract_strided_slice %20 {offsets = [0, 0], sizes = [8, 128], strides = [1, 1]} : vector<8x256xf32> to vector<8x128xf32>
    %22 = vector.extract_strided_slice %20 {offsets = [0, 128], sizes = [8, 128], strides = [1, 1]} : vector<8x256xf32> to vector<8x128xf32>
    %23 = vector.extract_strided_slice %9 {offsets = [0, 256], sizes = [8, 128], strides = [1, 1]} : vector<8x384xf32> to vector<8x128xf32>
    %24 = vector.extract_strided_slice %12 {offsets = [0, 256], sizes = [8, 128], strides = [1, 1]} : vector<8x384xf32> to vector<8x128xf32>
    %25 = vector.broadcast %7 : vector<1x128xf32> to vector<8x128xf32>
    %26 = arith.addf %24, %25 : vector<8x128xf32>
    %27 = arith.mulf %21, %26 : vector<8x128xf32>
    %28 = arith.addf %23, %27 : vector<8x128xf32>
    %29 = math.tanh %28 : vector<8x128xf32>
    %cst_17 = arith.constant 1.000000e+00 : f32
    %30 = vector.broadcast %cst_17 : f32 to vector<8x128xf32>
    %31 = arith.subf %30, %22 : vector<8x128xf32>
    %32 = arith.mulf %31, %29 : vector<8x128xf32>
    %33 = arith.mulf %22, %8 : vector<8x128xf32>
    %34 = arith.addf %32, %33 : vector<8x128xf32>
    %c8 = arith.constant 8 : index
    %c0_18 = arith.constant 0 : index
    %35 = vector.load %arg11[%c8, %c0_18] : memref<64x384xf32, #tpu.memory_space<vmem>>, vector<8x384xf32>
    %36 = vector.extract_strided_slice %34 {offsets = [0, 0], sizes = [8, 32], strides = [1, 1]} : vector<8x128xf32> to vector<8x32xf32>
    %c0_19 = arith.constant 0 : index
    %c0_20 = arith.constant 0 : index
    %37 = vector.load %arg4[%c0_19, %c0_20] : memref<32x384xf32, #tpu.memory_space<vmem>>, vector<32x384xf32>
    %cst_21 = arith.constant dense<0.000000e+00> : vector<8x384xf32>
    %38 = tpu.matmul %36, %37, %cst_21 {dimension_numbers = #tpu.dot_dimension_numbers<[1], [0], [0], [1], [0, 0, 1, 1], [], []>} : vector<8x32xf32>, vector<32x384xf32>, vector<8x384xf32> -> vector<8x384xf32>
    %39 = vector.extract_strided_slice %35 {offsets = [0, 0], sizes = [8, 256], strides = [1, 1]} : vector<8x384xf32> to vector<8x256xf32>
    %40 = vector.extract_strided_slice %38 {offsets = [0, 0], sizes = [8, 256], strides = [1, 1]} : vector<8x384xf32> to vector<8x256xf32>
    %41 = arith.addf %39, %40 : vector<8x256xf32>
    %42 = arith.negf %41 : vector<8x256xf32>
    %43 = math.exp %42 : vector<8x256xf32>
    %cst_22 = arith.constant 1.000000e+00 : f32
    %44 = vector.broadcast %cst_22 : f32 to vector<8x256xf32>
    %45 = arith.addf %44, %43 : vector<8x256xf32>
    %46 = arith.divf %44, %45 : vector<8x256xf32>
    %47 = vector.extract_strided_slice %46 {offsets = [0, 0], sizes = [8, 128], strides = [1, 1]} : vector<8x256xf32> to vector<8x128xf32>
    %48 = vector.extract_strided_slice %46 {offsets = [0, 128], sizes = [8, 128], strides = [1, 1]} : vector<8x256xf32> to vector<8x128xf32>
    %49 = vector.extract_strided_slice %35 {offsets = [0, 256], sizes = [8, 128], strides = [1, 1]} : vector<8x384xf32> to vector<8x128xf32>
    %50 = vector.extract_strided_slice %38 {offsets = [0, 256], sizes = [8, 128], strides = [1, 1]} : vector<8x384xf32> to vector<8x128xf32>
    %51 = vector.broadcast %7 : vector<1x128xf32> to vector<8x128xf32>
    %52 = arith.addf %50, %51 : vector<8x128xf32>
    %53 = arith.mulf %47, %52 : vector<8x128xf32>
    %54 = arith.addf %49, %53 : vector<8x128xf32>
    %55 = math.tanh %54 : vector<8x128xf32>
    %cst_23 = arith.constant 1.000000e+00 : f32
    %56 = vector.broadcast %cst_23 : f32 to vector<8x128xf32>
    %57 = arith.subf %56, %48 : vector<8x128xf32>
    %58 = arith.mulf %57, %55 : vector<8x128xf32>
    %59 = arith.mulf %48, %34 : vector<8x128xf32>
    %60 = arith.addf %58, %59 : vector<8x128xf32>
    %c16 = arith.constant 16 : index
    %c0_24 = arith.constant 0 : index
    %61 = vector.load %arg11[%c16, %c0_24] : memref<64x384xf32, #tpu.memory_space<vmem>>, vector<8x384xf32>
    %62 = vector.extract_strided_slice %60 {offsets = [0, 0], sizes = [8, 32], strides = [1, 1]} : vector<8x128xf32> to vector<8x32xf32>
    %c0_25 = arith.constant 0 : index
    %c0_26 = arith.constant 0 : index
    %63 = vector.load %arg4[%c0_25, %c0_26] : memref<32x384xf32, #tpu.memory_space<vmem>>, vector<32x384xf32>
    %cst_27 = arith.constant dense<0.000000e+00> : vector<8x384xf32>
    %64 = tpu.matmul %62, %63, %cst_27 {dimension_numbers = #tpu.dot_dimension_numbers<[1], [0], [0], [1], [0, 0, 1, 1], [], []>} : vector<8x32xf32>, vector<32x384xf32>, vector<8x384xf32> -> vector<8x384xf32>
    %65 = vector.extract_strided_slice %61 {offsets = [0, 0], sizes = [8, 256], strides = [1, 1]} : vector<8x384xf32> to vector<8x256xf32>
    %66 = vector.extract_strided_slice %64 {offsets = [0, 0], sizes = [8, 256], strides = [1, 1]} : vector<8x384xf32> to vector<8x256xf32>
    %67 = arith.addf %65, %66 : vector<8x256xf32>
    %68 = arith.negf %67 : vector<8x256xf32>
    %69 = math.exp %68 : vector<8x256xf32>
    %cst_28 = arith.constant 1.000000e+00 : f32
    %70 = vector.broadcast %cst_28 : f32 to vector<8x256xf32>
    %71 = arith.addf %70, %69 : vector<8x256xf32>
    %72 = arith.divf %70, %71 : vector<8x256xf32>
    %73 = vector.extract_strided_slice %72 {offsets = [0, 0], sizes = [8, 128], strides = [1, 1]} : vector<8x256xf32> to vector<8x128xf32>
    %74 = vector.extract_strided_slice %72 {offsets = [0, 128], sizes = [8, 128], strides = [1, 1]} : vector<8x256xf32> to vector<8x128xf32>
    %75 = vector.extract_strided_slice %61 {offsets = [0, 256], sizes = [8, 128], strides = [1, 1]} : vector<8x384xf32> to vector<8x128xf32>
    %76 = vector.extract_strided_slice %64 {offsets = [0, 256], sizes = [8, 128], strides = [1, 1]} : vector<8x384xf32> to vector<8x128xf32>
    %77 = vector.broadcast %7 : vector<1x128xf32> to vector<8x128xf32>
    %78 = arith.addf %76, %77 : vector<8x128xf32>
    %79 = arith.mulf %73, %78 : vector<8x128xf32>
    %80 = arith.addf %75, %79 : vector<8x128xf32>
    %81 = math.tanh %80 : vector<8x128xf32>
    %cst_29 = arith.constant 1.000000e+00 : f32
    %82 = vector.broadcast %cst_29 : f32 to vector<8x128xf32>
    %83 = arith.subf %82, %74 : vector<8x128xf32>
    %84 = arith.mulf %83, %81 : vector<8x128xf32>
    %85 = arith.mulf %74, %60 : vector<8x128xf32>
    %86 = arith.addf %84, %85 : vector<8x128xf32>
    %c24 = arith.constant 24 : index
    %c0_30 = arith.constant 0 : index
    %87 = vector.load %arg11[%c24, %c0_30] : memref<64x384xf32, #tpu.memory_space<vmem>>, vector<8x384xf32>
    %88 = vector.extract_strided_slice %86 {offsets = [0, 0], sizes = [8, 32], strides = [1, 1]} : vector<8x128xf32> to vector<8x32xf32>
    %c0_31 = arith.constant 0 : index
    %c0_32 = arith.constant 0 : index
    %89 = vector.load %arg4[%c0_31, %c0_32] : memref<32x384xf32, #tpu.memory_space<vmem>>, vector<32x384xf32>
    %cst_33 = arith.constant dense<0.000000e+00> : vector<8x384xf32>
    %90 = tpu.matmul %88, %89, %cst_33 {dimension_numbers = #tpu.dot_dimension_numbers<[1], [0], [0], [1], [0, 0, 1, 1], [], []>} : vector<8x32xf32>, vector<32x384xf32>, vector<8x384xf32> -> vector<8x384xf32>
    %91 = vector.extract_strided_slice %87 {offsets = [0, 0], sizes = [8, 256], strides = [1, 1]} : vector<8x384xf32> to vector<8x256xf32>
    %92 = vector.extract_strided_slice %90 {offsets = [0, 0], sizes = [8, 256], strides = [1, 1]} : vector<8x384xf32> to vector<8x256xf32>
    %93 = arith.addf %91, %92 : vector<8x256xf32>
    %94 = arith.negf %93 : vector<8x256xf32>
    %95 = math.exp %94 : vector<8x256xf32>
    %cst_34 = arith.constant 1.000000e+00 : f32
    %96 = vector.broadcast %cst_34 : f32 to vector<8x256xf32>
    %97 = arith.addf %96, %95 : vector<8x256xf32>
    %98 = arith.divf %96, %97 : vector<8x256xf32>
    %99 = vector.extract_strided_slice %98 {offsets = [0, 0], sizes = [8, 128], strides = [1, 1]} : vector<8x256xf32> to vector<8x128xf32>
    %100 = vector.extract_strided_slice %98 {offsets = [0, 128], sizes = [8, 128], strides = [1, 1]} : vector<8x256xf32> to vector<8x128xf32>
    %101 = vector.extract_strided_slice %87 {offsets = [0, 256], sizes = [8, 128], strides = [1, 1]} : vector<8x384xf32> to vector<8x128xf32>
    %102 = vector.extract_strided_slice %90 {offsets = [0, 256], sizes = [8, 128], strides = [1, 1]} : vector<8x384xf32> to vector<8x128xf32>
    %103 = vector.broadcast %7 : vector<1x128xf32> to vector<8x128xf32>
    %104 = arith.addf %102, %103 : vector<8x128xf32>
    %105 = arith.mulf %99, %104 : vector<8x128xf32>
    %106 = arith.addf %101, %105 : vector<8x128xf32>
    %107 = math.tanh %106 : vector<8x128xf32>
    %cst_35 = arith.constant 1.000000e+00 : f32
    %108 = vector.broadcast %cst_35 : f32 to vector<8x128xf32>
    %109 = arith.subf %108, %100 : vector<8x128xf32>
    %110 = arith.mulf %109, %107 : vector<8x128xf32>
    %111 = arith.mulf %100, %86 : vector<8x128xf32>
    %112 = arith.addf %110, %111 : vector<8x128xf32>
    %c32 = arith.constant 32 : index
    %c0_36 = arith.constant 0 : index
    %113 = vector.load %arg11[%c32, %c0_36] : memref<64x384xf32, #tpu.memory_space<vmem>>, vector<8x384xf32>
    %114 = vector.extract_strided_slice %112 {offsets = [0, 0], sizes = [8, 32], strides = [1, 1]} : vector<8x128xf32> to vector<8x32xf32>
    %c0_37 = arith.constant 0 : index
    %c0_38 = arith.constant 0 : index
    %115 = vector.load %arg4[%c0_37, %c0_38] : memref<32x384xf32, #tpu.memory_space<vmem>>, vector<32x384xf32>
    %cst_39 = arith.constant dense<0.000000e+00> : vector<8x384xf32>
    %116 = tpu.matmul %114, %115, %cst_39 {dimension_numbers = #tpu.dot_dimension_numbers<[1], [0], [0], [1], [0, 0, 1, 1], [], []>} : vector<8x32xf32>, vector<32x384xf32>, vector<8x384xf32> -> vector<8x384xf32>
    %117 = vector.extract_strided_slice %113 {offsets = [0, 0], sizes = [8, 256], strides = [1, 1]} : vector<8x384xf32> to vector<8x256xf32>
    %118 = vector.extract_strided_slice %116 {offsets = [0, 0], sizes = [8, 256], strides = [1, 1]} : vector<8x384xf32> to vector<8x256xf32>
    %119 = arith.addf %117, %118 : vector<8x256xf32>
    %120 = arith.negf %119 : vector<8x256xf32>
    %121 = math.exp %120 : vector<8x256xf32>
    %cst_40 = arith.constant 1.000000e+00 : f32
    %122 = vector.broadcast %cst_40 : f32 to vector<8x256xf32>
    %123 = arith.addf %122, %121 : vector<8x256xf32>
    %124 = arith.divf %122, %123 : vector<8x256xf32>
    %125 = vector.extract_strided_slice %124 {offsets = [0, 0], sizes = [8, 128], strides = [1, 1]} : vector<8x256xf32> to vector<8x128xf32>
    %126 = vector.extract_strided_slice %124 {offsets = [0, 128], sizes = [8, 128], strides = [1, 1]} : vector<8x256xf32> to vector<8x128xf32>
    %127 = vector.extract_strided_slice %113 {offsets = [0, 256], sizes = [8, 128], strides = [1, 1]} : vector<8x384xf32> to vector<8x128xf32>
    %128 = vector.extract_strided_slice %116 {offsets = [0, 256], sizes = [8, 128], strides = [1, 1]} : vector<8x384xf32> to vector<8x128xf32>
    %129 = vector.broadcast %7 : vector<1x128xf32> to vector<8x128xf32>
    %130 = arith.addf %128, %129 : vector<8x128xf32>
    %131 = arith.mulf %125, %130 : vector<8x128xf32>
    %132 = arith.addf %127, %131 : vector<8x128xf32>
    %133 = math.tanh %132 : vector<8x128xf32>
    %cst_41 = arith.constant 1.000000e+00 : f32
    %134 = vector.broadcast %cst_41 : f32 to vector<8x128xf32>
    %135 = arith.subf %134, %126 : vector<8x128xf32>
    %136 = arith.mulf %135, %133 : vector<8x128xf32>
    %137 = arith.mulf %126, %112 : vector<8x128xf32>
    %138 = arith.addf %136, %137 : vector<8x128xf32>
    %c40 = arith.constant 40 : index
    %c0_42 = arith.constant 0 : index
    %139 = vector.load %arg11[%c40, %c0_42] : memref<64x384xf32, #tpu.memory_space<vmem>>, vector<8x384xf32>
    %140 = vector.extract_strided_slice %138 {offsets = [0, 0], sizes = [8, 32], strides = [1, 1]} : vector<8x128xf32> to vector<8x32xf32>
    %c0_43 = arith.constant 0 : index
    %c0_44 = arith.constant 0 : index
    %141 = vector.load %arg4[%c0_43, %c0_44] : memref<32x384xf32, #tpu.memory_space<vmem>>, vector<32x384xf32>
    %cst_45 = arith.constant dense<0.000000e+00> : vector<8x384xf32>
    %142 = tpu.matmul %140, %141, %cst_45 {dimension_numbers = #tpu.dot_dimension_numbers<[1], [0], [0], [1], [0, 0, 1, 1], [], []>} : vector<8x32xf32>, vector<32x384xf32>, vector<8x384xf32> -> vector<8x384xf32>
    %143 = vector.extract_strided_slice %139 {offsets = [0, 0], sizes = [8, 256], strides = [1, 1]} : vector<8x384xf32> to vector<8x256xf32>
    %144 = vector.extract_strided_slice %142 {offsets = [0, 0], sizes = [8, 256], strides = [1, 1]} : vector<8x384xf32> to vector<8x256xf32>
    %145 = arith.addf %143, %144 : vector<8x256xf32>
    %146 = arith.negf %145 : vector<8x256xf32>
    %147 = math.exp %146 : vector<8x256xf32>
    %cst_46 = arith.constant 1.000000e+00 : f32
    %148 = vector.broadcast %cst_46 : f32 to vector<8x256xf32>
    %149 = arith.addf %148, %147 : vector<8x256xf32>
    %150 = arith.divf %148, %149 : vector<8x256xf32>
    %151 = vector.extract_strided_slice %150 {offsets = [0, 0], sizes = [8, 128], strides = [1, 1]} : vector<8x256xf32> to vector<8x128xf32>
    %152 = vector.extract_strided_slice %150 {offsets = [0, 128], sizes = [8, 128], strides = [1, 1]} : vector<8x256xf32> to vector<8x128xf32>
    %153 = vector.extract_strided_slice %139 {offsets = [0, 256], sizes = [8, 128], strides = [1, 1]} : vector<8x384xf32> to vector<8x128xf32>
    %154 = vector.extract_strided_slice %142 {offsets = [0, 256], sizes = [8, 128], strides = [1, 1]} : vector<8x384xf32> to vector<8x128xf32>
    %155 = vector.broadcast %7 : vector<1x128xf32> to vector<8x128xf32>
    %156 = arith.addf %154, %155 : vector<8x128xf32>
    %157 = arith.mulf %151, %156 : vector<8x128xf32>
    %158 = arith.addf %153, %157 : vector<8x128xf32>
    %159 = math.tanh %158 : vector<8x128xf32>
    %cst_47 = arith.constant 1.000000e+00 : f32
    %160 = vector.broadcast %cst_47 : f32 to vector<8x128xf32>
    %161 = arith.subf %160, %152 : vector<8x128xf32>
    %162 = arith.mulf %161, %159 : vector<8x128xf32>
    %163 = arith.mulf %152, %138 : vector<8x128xf32>
    %164 = arith.addf %162, %163 : vector<8x128xf32>
    %c48 = arith.constant 48 : index
    %c0_48 = arith.constant 0 : index
    %165 = vector.load %arg11[%c48, %c0_48] : memref<64x384xf32, #tpu.memory_space<vmem>>, vector<8x384xf32>
    %166 = vector.extract_strided_slice %164 {offsets = [0, 0], sizes = [8, 32], strides = [1, 1]} : vector<8x128xf32> to vector<8x32xf32>
    %c0_49 = arith.constant 0 : index
    %c0_50 = arith.constant 0 : index
    %167 = vector.load %arg4[%c0_49, %c0_50] : memref<32x384xf32, #tpu.memory_space<vmem>>, vector<32x384xf32>
    %cst_51 = arith.constant dense<0.000000e+00> : vector<8x384xf32>
    %168 = tpu.matmul %166, %167, %cst_51 {dimension_numbers = #tpu.dot_dimension_numbers<[1], [0], [0], [1], [0, 0, 1, 1], [], []>} : vector<8x32xf32>, vector<32x384xf32>, vector<8x384xf32> -> vector<8x384xf32>
    %169 = vector.extract_strided_slice %165 {offsets = [0, 0], sizes = [8, 256], strides = [1, 1]} : vector<8x384xf32> to vector<8x256xf32>
    %170 = vector.extract_strided_slice %168 {offsets = [0, 0], sizes = [8, 256], strides = [1, 1]} : vector<8x384xf32> to vector<8x256xf32>
    %171 = arith.addf %169, %170 : vector<8x256xf32>
    %172 = arith.negf %171 : vector<8x256xf32>
    %173 = math.exp %172 : vector<8x256xf32>
    %cst_52 = arith.constant 1.000000e+00 : f32
    %174 = vector.broadcast %cst_52 : f32 to vector<8x256xf32>
    %175 = arith.addf %174, %173 : vector<8x256xf32>
    %176 = arith.divf %174, %175 : vector<8x256xf32>
    %177 = vector.extract_strided_slice %176 {offsets = [0, 0], sizes = [8, 128], strides = [1, 1]} : vector<8x256xf32> to vector<8x128xf32>
    %178 = vector.extract_strided_slice %176 {offsets = [0, 128], sizes = [8, 128], strides = [1, 1]} : vector<8x256xf32> to vector<8x128xf32>
    %179 = vector.extract_strided_slice %165 {offsets = [0, 256], sizes = [8, 128], strides = [1, 1]} : vector<8x384xf32> to vector<8x128xf32>
    %180 = vector.extract_strided_slice %168 {offsets = [0, 256], sizes = [8, 128], strides = [1, 1]} : vector<8x384xf32> to vector<8x128xf32>
    %181 = vector.broadcast %7 : vector<1x128xf32> to vector<8x128xf32>
    %182 = arith.addf %180, %181 : vector<8x128xf32>
    %183 = arith.mulf %177, %182 : vector<8x128xf32>
    %184 = arith.addf %179, %183 : vector<8x128xf32>
    %185 = math.tanh %184 : vector<8x128xf32>
    %cst_53 = arith.constant 1.000000e+00 : f32
    %186 = vector.broadcast %cst_53 : f32 to vector<8x128xf32>
    %187 = arith.subf %186, %178 : vector<8x128xf32>
    %188 = arith.mulf %187, %185 : vector<8x128xf32>
    %189 = arith.mulf %178, %164 : vector<8x128xf32>
    %190 = arith.addf %188, %189 : vector<8x128xf32>
    %c56 = arith.constant 56 : index
    %c0_54 = arith.constant 0 : index
    %191 = vector.load %arg11[%c56, %c0_54] : memref<64x384xf32, #tpu.memory_space<vmem>>, vector<8x384xf32>
    %192 = vector.extract_strided_slice %190 {offsets = [0, 0], sizes = [8, 32], strides = [1, 1]} : vector<8x128xf32> to vector<8x32xf32>
    %c0_55 = arith.constant 0 : index
    %c0_56 = arith.constant 0 : index
    %193 = vector.load %arg4[%c0_55, %c0_56] : memref<32x384xf32, #tpu.memory_space<vmem>>, vector<32x384xf32>
    %cst_57 = arith.constant dense<0.000000e+00> : vector<8x384xf32>
    %194 = tpu.matmul %192, %193, %cst_57 {dimension_numbers = #tpu.dot_dimension_numbers<[1], [0], [0], [1], [0, 0, 1, 1], [], []>} : vector<8x32xf32>, vector<32x384xf32>, vector<8x384xf32> -> vector<8x384xf32>
    %195 = vector.extract_strided_slice %191 {offsets = [0, 0], sizes = [8, 256], strides = [1, 1]} : vector<8x384xf32> to vector<8x256xf32>
    %196 = vector.extract_strided_slice %194 {offsets = [0, 0], sizes = [8, 256], strides = [1, 1]} : vector<8x384xf32> to vector<8x256xf32>
    %197 = arith.addf %195, %196 : vector<8x256xf32>
    %198 = arith.negf %197 : vector<8x256xf32>
    %199 = math.exp %198 : vector<8x256xf32>
    %cst_58 = arith.constant 1.000000e+00 : f32
    %200 = vector.broadcast %cst_58 : f32 to vector<8x256xf32>
    %201 = arith.addf %200, %199 : vector<8x256xf32>
    %202 = arith.divf %200, %201 : vector<8x256xf32>
    %203 = vector.extract_strided_slice %202 {offsets = [0, 0], sizes = [8, 128], strides = [1, 1]} : vector<8x256xf32> to vector<8x128xf32>
    %204 = vector.extract_strided_slice %202 {offsets = [0, 128], sizes = [8, 128], strides = [1, 1]} : vector<8x256xf32> to vector<8x128xf32>
    %205 = vector.extract_strided_slice %191 {offsets = [0, 256], sizes = [8, 128], strides = [1, 1]} : vector<8x384xf32> to vector<8x128xf32>
    %206 = vector.extract_strided_slice %194 {offsets = [0, 256], sizes = [8, 128], strides = [1, 1]} : vector<8x384xf32> to vector<8x128xf32>
    %207 = vector.broadcast %7 : vector<1x128xf32> to vector<8x128xf32>
    %208 = arith.addf %206, %207 : vector<8x128xf32>
    %209 = arith.mulf %203, %208 : vector<8x128xf32>
    %210 = arith.addf %205, %209 : vector<8x128xf32>
    %211 = math.tanh %210 : vector<8x128xf32>
    %cst_59 = arith.constant 1.000000e+00 : f32
    %212 = vector.broadcast %cst_59 : f32 to vector<8x128xf32>
    %213 = arith.subf %212, %204 : vector<8x128xf32>
    %214 = arith.mulf %213, %211 : vector<8x128xf32>
    %215 = arith.mulf %204, %190 : vector<8x128xf32>
    %216 = arith.addf %214, %215 : vector<8x128xf32>
    %217 = vector.extract_strided_slice %216 {offsets = [0, 0], sizes = [8, 32], strides = [1, 1]} : vector<8x128xf32> to vector<8x32xf32>
    %c0_60 = arith.constant 0 : index
    %c0_61 = arith.constant 0 : index
    %218 = vector.load %arg7[%c0_60, %c0_61] : memref<32x128xf32, #tpu.memory_space<vmem>>, vector<32x128xf32>
    %cst_62 = arith.constant dense<0.000000e+00> : vector<8x128xf32>
    %219 = tpu.matmul %217, %218, %cst_62 {dimension_numbers = #tpu.dot_dimension_numbers<[1], [0], [0], [1], [0, 0, 1, 1], [], []>} : vector<8x32xf32>, vector<32x128xf32>, vector<8x128xf32> -> vector<8x128xf32>
    %c0_63 = arith.constant 0 : index
    %c0_64 = arith.constant 0 : index
    %220 = vector.load %arg8[%c0_63, %c0_64] : memref<1x128xf32, #tpu.memory_space<vmem>>, vector<1x128xf32>
    %221 = vector.broadcast %220 : vector<1x128xf32> to vector<8x128xf32>
    %222 = arith.addf %219, %221 : vector<8x128xf32>
    %c0_65 = arith.constant 0 : index
    %c0_66 = arith.constant 0 : index
    %223 = vector.load %arg9[%c0_65, %c0_66] : memref<8x128xf32, #tpu.memory_space<vmem>>, vector<8x128xf32>
    tpu.vector_store %arg9[%c0_65, %c0_66], %222 {strides = array<i32>} : memref<8x128xf32, #tpu.memory_space<vmem>>, vector<8x128xf32>,
    %c0_67 = arith.constant 0 : index
    %c0_68 = arith.constant 0 : index
    %224 = vector.load %arg10[%c0_67, %c0_68] : memref<8x128xf32, #tpu.memory_space<vmem>>, vector<8x128xf32>
    tpu.vector_store %arg10[%c0_67, %c0_68], %216 {strides = array<i32>} : memref<8x128xf32, #tpu.memory_space<vmem>>, vector<8x128xf32>,
    return
  }
  func.func @transform_0(%arg0: i32) -> (i32, i32) {
    %c0_i32 = arith.constant 0 : i32
    %c0_i32_0 = arith.constant 0 : i32
    %c0_i32_1 = arith.constant 0 : i32
    return %c0_i32, %c0_i32_0 : i32, i32
  }
  func.func @transform_1(%arg0: i32) -> (i32, i32) {
    %c0_i32 = arith.constant 0 : i32
    %c0_i32_0 = arith.constant 0 : i32
    %c0_i32_1 = arith.constant 0 : i32
    return %c0_i32, %c0_i32_0 : i32, i32
  }
  func.func @transform_2(%arg0: i32) -> (i32, i32) {
    %c0_i32 = arith.constant 0 : i32
    %c0_i32_0 = arith.constant 0 : i32
    %c0_i32_1 = arith.constant 0 : i32
    return %c0_i32, %c0_i32_0 : i32, i32
  }
  func.func @transform_3(%arg0: i32) -> (i32, i32) {
    %c0_i32 = arith.constant 0 : i32
    %c0_i32_0 = arith.constant 0 : i32
    %c0_i32_1 = arith.constant 0 : i32
    return %c0_i32, %c0_i32_0 : i32, i32
  }
  func.func @transform_4(%arg0: i32) -> (i32, i32) {
    %c0_i32 = arith.constant 0 : i32
    %c0_i32_0 = arith.constant 0 : i32
    %c0_i32_1 = arith.constant 0 : i32
    return %c0_i32, %c0_i32_0 : i32, i32
  }
  func.func @transform_5(%arg0: i32) -> (i32, i32) {
    %c0_i32 = arith.constant 0 : i32
    %c0_i32_0 = arith.constant 0 : i32
    %c0_i32_1 = arith.constant 0 : i32
    return %c0_i32, %c0_i32_0 : i32, i32
  }
  func.func @transform_6(%arg0: i32) -> (i32, i32) {
    %c0_i32 = arith.constant 0 : i32
    %c0_i32_0 = arith.constant 0 : i32
    %c0_i32_1 = arith.constant 0 : i32
    return %c0_i32, %c0_i32_0 : i32, i32
  }
  func.func @transform_7(%arg0: i32) -> (i32, i32) {
    %c0_i32 = arith.constant 0 : i32
    %c0_i32_0 = arith.constant 0 : i32
    %c0_i32_1 = arith.constant 0 : i32
    return %c0_i32, %c0_i32_0 : i32, i32
  }
  func.func @transform_8(%arg0: i32) -> (i32, i32) {
    %c0_i32 = arith.constant 0 : i32
    %c0_i32_0 = arith.constant 0 : i32
    %c0_i32_1 = arith.constant 0 : i32
    return %c0_i32, %c0_i32_0 : i32, i32
  }
  func.func @transform_9(%arg0: i32) -> (i32, i32) {
    %c0_i32 = arith.constant 0 : i32
    %c0_i32_0 = arith.constant 0 : i32
    %c0_i32_1 = arith.constant 0 : i32
    return %c0_i32, %c0_i32_0 : i32, i32
  }
}

</mosaic_0001>

<bundles_post_ra>
// kernel: basenet_forward.1
= control target key start
LH: loop header
LB: loop body
LE: loop exit
PB: predicated region body
PF: predicated region fallthrough
CT: control target
= control target key end

     0   :  { %vm53_vm0 = vcmask 130048   ;;  %vm242_vm1 = vcmask 261120   ;;  %s1788_s3 = inlined_call_operand.vmem [shape: f32[32,384], index: 3, kind: input, shape index: {}]   ;;  %s1789_s2 = inlined_call_operand.vmem [shape: f32[16,384], index: 2, kind: input, shape index: {}]   ;;  %s1790_s0 = inlined_call_operand.vmem [shape: f32[64,16], index: 0, kind: input, shape index: {}]   ;;  %s1791_s1 = inlined_call_operand.vmem [shape: f32[8,128], index: 1, kind: input, shape index: {}]   ;;  %s1792_s5 = inlined_call_operand.vmem [shape: f32[1,128], index: 5, kind: input, shape index: {}]   ;;  %s1793_s4 = inlined_call_operand.vmem [shape: f32[1,384], index: 4, kind: input, shape index: {}]   ;;  %s1794_s7 = inlined_call_operand.vmem [shape: f32[1,128], index: 7, kind: input, shape index: {}]   ;;  %s1795_s6 = inlined_call_operand.vmem [shape: f32[32,128], index: 6, kind: input, shape index: {}]   ;;  %s1796_s9 = inlined_call_operand.vmem [shape: f32[8,128], index: 9, kind: output, shape index: {1}]   ;;  %s1797_s8 = inlined_call_operand.vmem [shape: f32[8,128], index: 8, kind: output, shape index: {0}]  }
   0x1   :  { %v1397_v0 = vld [vmem:[%s1788_s3 + $0x48] sm:$0xff]  ;;  %v1402_v1 = vld [vmem:[%s1788_s3 + $0x30] sm:$0xff]  ;;  %v42_v2 = vld [vmem:[%s1789_s2 + $0x18] sm:$0xff] }
   0x2   :  { %258 = vmatpush.msra.mxu3 %v1397_v0  ;;  %v1411_v3 = vld [vmem:[%s1788_s3 + $0x18] sm:$0xff]  ;;  %92 = vmatpush.msra.mxu0 %v42_v2  ;;  %v39_v4 = vld [vmem:[%s1789_s2] sm:$0xff]  ;;  %v40_v9 = vld [vmem:[%s1789_s2 + $0x8] sm:$0xff] }
   0x3   :  { %v31_v5 = vld [vmem:[%s1790_s0] sm:$0xff]  ;;  %v1441_v10 = vld [vmem:[%s1788_s3 + $0x58] sm:$0xff]  ;;  %v1446_v11 = vld [vmem:[%s1788_s3 + $0x50] sm:$0xff] }
   0x4   :  { %259 = vmatpush.msra.mxu3 %v1402_v1  ;;  %v1423_v6 = vld [vmem:[%s1788_s3] sm:$0xff]  ;;  %93 = vmatpush.msra.mxu0 %v39_v4  ;;  %v44_v12 = vld [vmem:[%s1789_s2 + $0x28] sm:$0xff]  ;;  %v41_v13 = vld [vmem:[%s1789_s2 + $0x10] sm:$0xff] }
   0x5   :  { %v43_v7 = vld [vmem:[%s1789_s2 + $0x20] sm:$0xff]  ;;  %1196 = vmatmul.msk.f32.vlgmr.msra.gmra.mxu0 %vm53_vm0, %v31_v5  ;;  %174 = vmatpush.msra.mxu2 %v44_v12  ;;  %v1461_v14 = vld [vmem:[%s1788_s3 + $0x38] sm:$0xff]  ;;  %v1480_v17 = vld [vmem:[%s1788_s3 + $0x28] sm:$0xff] }
   0x6   :  { %260 = vmatpush.msra.mxu3 %v1411_v3  ;;  %v1432_v8 = vld [vmem:[%s1791_s1] sm:$0xff]  ;;  %133 = vmatpush.msra.mxu1 %v43_v7  ;;  %v1486_v18 = vld [vmem:[%s1788_s3 + $0x8] sm:$0xff]  ;;  %v1494_v19 = vld [vmem:[%s1788_s3 + $0x10] sm:$0xff] }
   0x7   :  { %529 = vmatpush.msrb.mxu0 %v1441_v10  ;;  %v1468_v15 = vld [vmem:[%s1788_s3 + $0x40] sm:$0xff]  ;;  %175 = vmatpush.msra.mxu2 %v41_v13  ;;  %v32_v35 = vld [vmem:[%s1790_s0 + $0x8] sm:$0xff] }
   0x8   :  { %261 = vmatpush.msra.mxu3 %v1423_v6  ;;  %134 = vmatpush.msra.mxu1 %v40_v9  ;;  %v1473_v16 = vld [vmem:[%s1788_s3 + $0x20] sm:$0xff] }
   0x9   :  { %1220 = vmatmul.msk.f32.vlgmr.msra.gmra.mxu3 %vm242_vm1, %v1432_v8  ;;  %1204 = vmatmul.msk.f32.vlgmr.msra.gmra.mxu1 %vm53_vm0, %v31_v5  ;;  %v45_v20 = vld [vmem:[%s1793_s4] sm:$0x7] }
   0xa   :  { %278 = vmatpush.msrb.mxu3 %v1446_v11  ;;  %530 = vmatpush.msrb.mxu0 %v1468_v15  ;;  %v1536_v21 = vperm.slane %v45_v20, 0  ;;  %v1539_v26 = vperm.slane %v45_v20, 1  ;;  %v1551_v41 = vld [vmem:[%s1792_s5] ss:$0 sm:$0xff]  ;;  %v1553_v46 = vperm.slane %v45_v20, 2  ;;  %v34_v20 = vld [vmem:[%s1790_s0 + $0x18] sm:$0xff] }
   0xb   :  { %1212 = vmatmul.msk.f32.vlgmr.msra.gmra.mxu2 %vm53_vm0, %v31_v5  ;;  %603 = vmatpush.msrb.mxu1 %v1397_v0 }
   0xc   :  { %279 = vmatpush.msrb.mxu3 %v1461_v14  ;;  %531 = vmatpush.msrb.mxu0 %v1480_v17 }
   0xd   :  { %623 = vmatpush.msrb.mxu2 %v1446_v11  ;;  %604 = vmatpush.msrb.mxu1 %v1402_v1 }
   0xe   :  { %280 = vmatpush.msrb.mxu3 %v1473_v16  ;;  %532 = vmatpush.msrb.mxu0 %v1494_v19 }
   0xf   :  { %624 = vmatpush.msrb.mxu2 %v1461_v14  ;;  %605 = vmatpush.msrb.mxu1 %v1411_v3 }
  0x10   :  { %281 = vmatpush.msrb.mxu3 %v1486_v18  ;;  %717 = vmatpush.msra.mxu0 %v1397_v0 }
  0x11   :  { %1221 = vmatmul.msk.f32.vlgmr.msrb.gmra.mxu3 %vm242_vm1, %v1432_v8  ;;  %625 = vmatpush.msrb.mxu2 %v1473_v16 }
  0x12   :  { %298 = vmatpush.msra.mxu3 %v1441_v10  ;;  %606 = vmatpush.msrb.mxu1 %v1423_v6 }
  0x13   :  { %626 = vmatpush.msrb.mxu2 %v1486_v18  ;;  %718 = vmatpush.msra.mxu0 %v1402_v1 }
  0x14   :  { %299 = vmatpush.msra.mxu3 %v1468_v15  ;;  %737 = vmatpush.msra.mxu1 %v1446_v11 }
  0x15   :  { %757 = vmatpush.msra.mxu2 %v1441_v10  ;;  %719 = vmatpush.msra.mxu0 %v1411_v3 }
  0x16   :  { %300 = vmatpush.msra.mxu3 %v1480_v17  ;;  %738 = vmatpush.msra.mxu1 %v1461_v14 }
  0x17   :  { %758 = vmatpush.msra.mxu2 %v1468_v15  ;;  %720 = vmatpush.msra.mxu0 %v1423_v6 }
  0x18   :  { %301 = vmatpush.msra.mxu3 %v1494_v19  ;;  %739 = vmatpush.msra.mxu1 %v1473_v16 }
  0x19   :  { %1222 = vmatmul.msk.f32.vlgmr.msra.gmra.mxu3 %vm242_vm1, %v1432_v8  ;;  %759 = vmatpush.msra.mxu2 %v1480_v17 }
  0x1a   :  { %375 = vmatpush.msrb.mxu3 %v1397_v0  ;;  %740 = vmatpush.msra.mxu1 %v1486_v18 }
  0x1b   :  { %760 = vmatpush.msra.mxu2 %v1494_v19  ;;  %1197 = vmatmul.msk.f32.gmra.mxu0 %vm53_vm0, %v32_v35 }
  0x1c   :  { %376 = vmatpush.msrb.mxu3 %v1402_v1  ;;  %1205 = vmatmul.msk.f32.gmra.mxu1 %vm53_vm0, %v32_v35 }
  0x1d   :  { %1213 = vmatmul.msk.f32.gmra.mxu2 %vm53_vm0, %v32_v35 }
  0x1e   :  { %377 = vmatpush.msrb.mxu3 %v1411_v3 }
  0x20   :  { %378 = vmatpush.msrb.mxu3 %v1423_v6 }
  0x22   :  { %395 = vmatpush.msra.mxu3 %v1446_v11 }
  0x24   :  { %396 = vmatpush.msra.mxu3 %v1461_v14 }
  0x26   :  { %397 = vmatpush.msra.mxu3 %v1473_v16 }
  0x28   :  { %398 = vmatpush.msra.mxu3 %v1486_v18 }
  0x82   :  { %v95_v22 = vpop.f32.mrf.mxu0 }
  0x83   :  { %v96_v23 = vadd.f32 %v95_v22, %v1536_v21  ;;  %v35_v22 = vld [vmem:[%s1790_s0 + $0x20] sm:$0xff] }
  0x86   :  { %v136_v27 = vpop.f32.mrf.mxu1 }
  0x87   :  { %v137_v29 = vadd.f32 %v136_v27, %v1539_v26  ;;  %v37_v27 = vld [vmem:[%s1790_s0 + $0x30] sm:$0xff] }
  0x8c   :  { %v263_v24 = vpop.f32.mrf.mxu3 }
  0x8d   :  { %v306_v25 = vadd.f32 %v263_v24, %v96_v23  ;;  %v36_v23 = vld [vmem:[%s1790_s0 + $0x28] sm:$0xff] }
  0x8e   :  { %v177_v47 = vpop.f32.mrf.mxu2 }
  0x8f   :  { %v1223_v28 = vmul.f32 -1.442695, %v306_v25  ;;  %v178_v54 = vadd.f32 %v177_v47, %v1553_v46 }
  0x91   :  { %1263 = vpow2.f32 %v1223_v28 }
  0x94   :  { %v283_v30 = vpop.f32.mrf.mxu3 }
  0x95   :  { %v307_v31 = vadd.f32 %v283_v30, %v137_v29 }
  0x97   :  { %v1264_v32 = vpop.eup %1263  ;;  %v1224_v33 = vmul.f32 -1.442695, %v307_v31 }
  0x98   :  { %v314_v34 = vadd.f32 1.0, %v1264_v32  ;;  %v98_v24 = vpop.f32.mrf.mxu0 }
  0x99   :  { %1265 = vpow2.f32 %v1224_v33  ;;  %v99_v25 = vadd.f32 %v98_v24, %v1536_v21  ;;  %v139_v30 = vpop.f32.mrf.mxu1  ;;  %v38_v33 = vld [vmem:[%s1790_s0 + $0x38] sm:$0xff] }
  0x9a   :  { %1267 = vrcp.f32 %v314_v34  ;;  %v327_v43 = vand.u32 2147483648, %v314_v34  ;;  %v325_v45 = vand.u32 2147483647, %v314_v34  ;;  %vm321_vm3 = vweird.f32 %v314_v34 }
  0x9b   :  { %v140_v32 = vadd.f32 %v139_v30, %v1539_v26 }
  0x9c   :  { %v303_v42 = vpop.f32.mrf.mxu3  ;;  %v328_v51 = vor.u32 1.1754944e-38, %v327_v43  ;;  %vm326_vm5 = vcmp.eq.f32.partialorder %v325_v45, 8.507059e+37 }
  0x9d   :  { %v349_v49 = vadd.f32 %v1551_v41, %v303_v42 }
  0x9f   :  { %v1266_v36 = vpop.eup %1265 }
  0xa0   :  { %v1268_v37 = vpop.eup %1267  ;;  %v315_v38 = vadd.f32 1.0, %v1266_v36 }
  0xa1   :  { %v317_v39 = vmul.f32 %v1268_v37, %v314_v34  ;;  %vm322_vm2 = vweird.f32 %v1268_v37 }
  0xa2   :  { %1269 = vrcp.f32 %v315_v38  ;;  %vm323_vm4 = vmor %vm321_vm3, %vm322_vm2  ;;  %v342_v58 = vand.u32 2147483648, %v315_v38  ;;  %v340_v60 = vand.u32 2147483647, %v315_v38  ;;  %vm336_vm7 = vweird.f32 %v315_v38 }
  0xa3   :  { %v318_v40 = vsub.f32 1.0, %v317_v39 }
  0xa4   :  { %v343_v63 = vor.u32 1.1754944e-38, %v342_v58  ;;  %vm341_vm9 = vcmp.eq.f32.partialorder %v340_v60, 8.507059e+37 }
  0xa5   :  { %v319_v44 = vmul.f32 %v1268_v37, %v318_v40 }
  0xa7   :  { %v320_v48 = vadd.f32 %v1268_v37, %v319_v44 }
  0xa8   :  { %v1270_v50 = vpop.eup %1269 }
  0xa9   :  { %v332_v52 = vmul.f32 %v1270_v50, %v315_v38  ;;  %v324_v53 = vsel %vm323_vm4, %v1268_v37, %v320_v48  ;;  %vm337_vm6 = vweird.f32 %v1270_v50 }
  0xaa   :  { %v329_v55 = vsel %vm326_vm5, %v328_v51, %v324_v53  ;;  %vm338_vm8 = vmor %vm336_vm7, %vm337_vm6 }
  0xab   :  { %v333_v56 = vsub.f32 1.0, %v332_v52  ;;  %v350_v57 = vmul.f32 %v349_v49, %v329_v55  ;;  %v180_v49 = vpop.f32.mrf.mxu2 }
  0xad   :  { %v334_v59 = vmul.f32 %v1270_v50, %v333_v56  ;;  %v351_v61 = vadd.f32 %v350_v57, %v178_v54  ;;  %v181_v54 = vadd.f32 %v180_v49, %v1553_v46 }
  0xaf   :  { %v335_v62 = vadd.f32 %v1270_v50, %v334_v59  ;;  %1271 = vtanh.f32 %v351_v61 }
  0xb1   :  { %v339_v2 = vsel %vm338_vm8, %v1270_v50, %v335_v62 }
  0xb2   :  { %v344_v4 = vsel %vm341_vm9, %v343_v63, %v339_v2 }
  0xb3   :  { %v353_v5 = vsub.f32 1.0, %v344_v4  ;;  %v355_v12 = vmul.f32 %v344_v4, %v1432_v8  ;;  %v33_v8 = vld [vmem:[%s1790_s0 + $0x10] sm:$0xff] }
  0xb4   :  { %1198 = vmatmul.msk.f32.gmra.mxu0 %vm53_vm0, %v33_v8  ;;  %1206 = vmatmul.msk.f32.gmra.mxu1 %vm53_vm0, %v33_v8 }
  0xb5   :  { %v1272_v7 = vpop.eup %1271  ;;  %1214 = vmatmul.msk.f32.gmra.mxu2 %vm53_vm0, %v33_v8 }
  0xb6   :  { %v354_v9 = vmul.f32 %v1272_v7, %v353_v5 }
  0xb8   :  { %v1558_v13 = vadd.f32 %v355_v12, %v354_v9 }
  0xba   :  { %1225 = vmatmul.msk.f32.vlgmr.msrb.gmra.mxu3 %vm242_vm1, %v1558_v13 }
  0xbb   :  { %415 = vmatpush.msrb.mxu3 %v1441_v10 }
  0xbc   :  { %1199 = vmatmul.msk.f32.gmra.mxu0 %vm53_vm0, %v34_v20  ;;  %1207 = vmatmul.msk.f32.gmra.mxu1 %vm53_vm0, %v34_v20 }
  0xbd   :  { %416 = vmatpush.msrb.mxu3 %v1468_v15  ;;  %1215 = vmatmul.msk.f32.gmra.mxu2 %vm53_vm0, %v34_v20 }
  0xbf   :  { %417 = vmatpush.msrb.mxu3 %v1480_v17 }
  0xc1   :  { %418 = vmatpush.msrb.mxu3 %v1494_v19 }
  0xc2   :  { %1226 = vmatmul.msk.f32.vlgmr.msra.gmra.mxu3 %vm242_vm1, %v1558_v13 }
  0xc3   :  { %489 = vmatpush.msra.mxu3 %v1397_v0 }
  0xc4   :  { %1200 = vmatmul.msk.f32.gmra.mxu0 %vm53_vm0, %v35_v22  ;;  %1208 = vmatmul.msk.f32.gmra.mxu1 %vm53_vm0, %v35_v22 }
  0xc5   :  { %490 = vmatpush.msra.mxu3 %v1402_v1  ;;  %1216 = vmatmul.msk.f32.gmra.mxu2 %vm53_vm0, %v35_v22 }
  0xc7   :  { %491 = vmatpush.msra.mxu3 %v1411_v3 }
  0xc9   :  { %492 = vmatpush.msra.mxu3 %v1423_v6 }
  0xca   :  { %1227 = vmatmul.msk.f32.vlgmr.msrb.gmra.mxu3 %vm242_vm1, %v1558_v13 }
  0xcb   :  { %509 = vmatpush.msrb.mxu3 %v1446_v11 }
  0xcc   :  { %1201 = vmatmul.msk.f32.gmra.mxu0 %vm53_vm0, %v36_v23  ;;  %1209 = vmatmul.msk.f32.gmra.mxu1 %vm53_vm0, %v36_v23 }
  0xcd   :  { %510 = vmatpush.msrb.mxu3 %v1461_v14  ;;  %1217 = vmatmul.msk.f32.gmra.mxu2 %vm53_vm0, %v36_v23 }
  0xcf   :  { %511 = vmatpush.msrb.mxu3 %v1473_v16 }
  0xd1   :  { %512 = vmatpush.msrb.mxu3 %v1486_v18 }
  0xd4   :  { %1202 = vmatmul.msk.f32.gmra.mxu0 %vm53_vm0, %v37_v27  ;;  %1210 = vmatmul.msk.f32.gmra.mxu1 %vm53_vm0, %v37_v27 }
  0xd5   :  { %1218 = vmatmul.msk.f32.gmra.mxu2 %vm53_vm0, %v37_v27 }
  0xdc   :  { %1203 = vmatmul.msk.f32.gmra.mxu0 %vm53_vm0, %v38_v33  ;;  %1211 = vmatmul.msk.f32.gmra.mxu1 %vm53_vm0, %v38_v33 }
  0xdd   :  { %1219 = vmatmul.msk.f32.gmra.mxu2 %vm53_vm0, %v38_v33 }
 0x13d   :  { %v380_v28 = vpop.f32.mrf.mxu3 }
 0x13e   :  { %v423_v29 = vadd.f32 %v380_v28, %v99_v25 }
 0x140   :  { %v1228_v31 = vmul.f32 -1.442695, %v423_v29 }
 0x142   :  { %1273 = vpow2.f32 %v1228_v31  ;;  %v142_v31 = vpop.f32.mrf.mxu1 }
 0x145   :  { %v400_v34 = vpop.f32.mrf.mxu3 }
 0x146   :  { %v424_v35 = vadd.f32 %v400_v34, %v140_v32  ;;  %v143_v34 = vadd.f32 %v142_v31, %v1539_v26 }
 0x148   :  { %v1274_v36 = vpop.eup %1273  ;;  %v1229_v37 = vmul.f32 -1.442695, %v424_v35 }
 0x149   :  { %v431_v38 = vadd.f32 1.0, %v1274_v36 }
 0x14a   :  { %1275 = vpow2.f32 %v1229_v37 }
 0x14b   :  { %1277 = vrcp.f32 %v431_v38  ;;  %v444_v45 = vand.u32 2147483648, %v431_v38  ;;  %v442_v48 = vand.u32 2147483647, %v431_v38  ;;  %vm438_vm11 = vweird.f32 %v431_v38 }
 0x14d   :  { %v420_v50 = vpop.f32.mrf.mxu3  ;;  %v445_v53 = vor.u32 1.1754944e-38, %v444_v45  ;;  %vm443_vm13 = vcmp.eq.f32.partialorder %v442_v48, 8.507059e+37 }
 0x14e   :  { %v463_v57 = vadd.f32 %v1551_v41, %v420_v50 }
 0x150   :  { %v1276_v39 = vpop.eup %1275 }
 0x151   :  { %v1278_v40 = vpop.eup %1277  ;;  %v432_v42 = vadd.f32 1.0, %v1276_v39 }
 0x152   :  { %v434_v43 = vmul.f32 %v1278_v40, %v431_v38  ;;  %vm439_vm10 = vweird.f32 %v1278_v40 }
 0x153   :  { %1279 = vrcp.f32 %v432_v42  ;;  %vm440_vm12 = vmor %vm438_vm11, %vm439_vm10  ;;  %v459_v61 = vand.u32 2147483648, %v432_v42  ;;  %v457_v63 = vand.u32 2147483647, %v432_v42  ;;  %vm453_vm15 = vweird.f32 %v432_v42 }
 0x154   :  { %v435_v44 = vsub.f32 1.0, %v434_v43 }
 0x155   :  { %v460_v5 = vor.u32 1.1754944e-38, %v459_v61  ;;  %vm458_vm2 = vcmp.eq.f32.partialorder %v457_v63, 8.507059e+37 }
 0x156   :  { %v436_v47 = vmul.f32 %v1278_v40, %v435_v44 }
 0x158   :  { %v437_v51 = vadd.f32 %v1278_v40, %v436_v47 }
 0x159   :  { %v1280_v52 = vpop.eup %1279 }
 0x15a   :  { %v449_v55 = vmul.f32 %v1280_v52, %v432_v42  ;;  %v441_v56 = vsel %vm440_vm12, %v1278_v40, %v437_v51  ;;  %vm454_vm14 = vweird.f32 %v1280_v52 }
 0x15b   :  { %v446_v58 = vsel %vm443_vm13, %v445_v53, %v441_v56  ;;  %vm455_vm0 = vmor %vm453_vm15, %vm454_vm14 }
 0x15c   :  { %v450_v59 = vsub.f32 1.0, %v449_v55  ;;  %v464_v60 = vmul.f32 %v463_v57, %v446_v58 }
 0x15e   :  { %v451_v62 = vmul.f32 %v1280_v52, %v450_v59  ;;  %v465_v2 = vadd.f32 %v464_v60, %v181_v54 }
 0x160   :  { %v452_v4 = vadd.f32 %v1280_v52, %v451_v62  ;;  %1281 = vtanh.f32 %v465_v2 }
 0x162   :  { %v456_v7 = vsel %vm455_vm0, %v1280_v52, %v452_v4  ;;  %v183_v52 = vpop.f32.mrf.mxu2 }
 0x163   :  { %v461_v9 = vsel %vm458_vm2, %v460_v5, %v456_v7  ;;  %v184_v58 = vadd.f32 %v183_v52, %v1553_v46 }
 0x164   :  { %v467_v12 = vsub.f32 1.0, %v461_v9  ;;  %v469_v22 = vmul.f32 %v461_v9, %v1558_v13  ;;  %v101_v13 = vpop.f32.mrf.mxu0 }
 0x165   :  { %v102_v28 = vadd.f32 %v101_v13, %v1536_v21 }
 0x166   :  { %v1282_v8 = vpop.eup %1281 }
 0x167   :  { %v468_v20 = vmul.f32 %v1282_v8, %v467_v12 }
 0x169   :  { %v1619_v23 = vadd.f32 %v469_v22, %v468_v20 }
 0x16b   :  { %1230 = vmatmul.msk.f32.vlgmr.msra.gmra.mxu3 %vm242_vm1, %v1619_v23  ;;  %1232 = vmatmul.msk.f32.vlgmr.msrb.gmra.mxu0 %vm242_vm1, %v1619_v23 }
 0x16c   :  { %643 = vmatpush.msra.mxu3 %v1441_v10  ;;  %851 = vmatpush.msrb.mxu0 %v1446_v11  ;;  %v1639_v24 = vpop.f32.mrf.mxu0 }
 0x16e   :  { %644 = vmatpush.msra.mxu3 %v1468_v15  ;;  %852 = vmatpush.msrb.mxu0 %v1461_v14 }
 0x170   :  { %645 = vmatpush.msra.mxu3 %v1480_v17  ;;  %853 = vmatpush.msrb.mxu0 %v1473_v16 }
 0x172   :  { %646 = vmatpush.msra.mxu3 %v1494_v19  ;;  %854 = vmatpush.msrb.mxu0 %v1486_v18 }
 0x173   :  { %1231 = vmatmul.msk.f32.vlgmr.msrb.gmra.mxu3 %vm242_vm1, %v1619_v23 }
 0x174   :  { %831 = vmatpush.msrb.mxu3 %v1397_v0  ;;  %v1641_v25 = vpop.f32.mrf.mxu0 }
 0x176   :  { %832 = vmatpush.msrb.mxu3 %v1402_v1 }
 0x178   :  { %833 = vmatpush.msrb.mxu3 %v1411_v3 }
 0x17a   :  { %834 = vmatpush.msrb.mxu3 %v1423_v6 }
 0x17c   :  { %v1643_v27 = vpop.f32.mrf.mxu0 }
 0x184   :  { %v1646_v33 = vpop.f32.mrf.mxu0 }
 0x18c   :  { %v1649_v40 = vpop.f32.mrf.mxu0 }
 0x1e8   :  { %v534_v49 = vpop.f32.mrf.mxu0 }
 0x1e9   :  { %v577_v55 = vadd.f32 %v1551_v41, %v534_v49 }
 0x1ee   :  { %v494_v29 = vpop.f32.mrf.mxu3 }
 0x1ef   :  { %v537_v30 = vadd.f32 %v494_v29, %v102_v28 }
 0x1f1   :  { %v1233_v32 = vmul.f32 -1.442695, %v537_v30  ;;  %v186_v30 = vpop.f32.mrf.mxu2 }
 0x1f3   :  { %1283 = vpow2.f32 %v1233_v32 }
 0x1f6   :  { %v514_v35 = vpop.f32.mrf.mxu3 }
 0x1f7   :  { %v538_v36 = vadd.f32 %v514_v35, %v143_v34 }
 0x1f9   :  { %v1284_v37 = vpop.eup %1283  ;;  %v1234_v38 = vmul.f32 -1.442695, %v538_v36  ;;  %v1676_v32 = vpop.f32.mrf.mxu2 }
 0x1fa   :  { %v545_v39 = vadd.f32 1.0, %v1284_v37 }
 0x1fb   :  { %1285 = vpow2.f32 %v1234_v38 }
 0x1fc   :  { %1287 = vrcp.f32 %v545_v39  ;;  %v558_v48 = vand.u32 2147483648, %v545_v39  ;;  %v556_v51 = vand.u32 2147483647, %v545_v39  ;;  %vm552_vm4 = vweird.f32 %v545_v39 }
 0x1fe   :  { %v559_v56 = vor.u32 1.1754944e-38, %v558_v48  ;;  %vm557_vm6 = vcmp.eq.f32.partialorder %v556_v51, 8.507059e+37 }
 0x201   :  { %v1286_v42 = vpop.eup %1285  ;;  %v1680_v35 = vpop.f32.mrf.mxu2 }
 0x202   :  { %v1288_v43 = vpop.eup %1287  ;;  %v546_v44 = vadd.f32 1.0, %v1286_v42  ;;  %v105_v42 = vadd.f32 %v1639_v24, %v1536_v21 }
 0x203   :  { %v548_v45 = vmul.f32 %v1288_v43, %v545_v39  ;;  %vm553_vm3 = vweird.f32 %v1288_v43 }
 0x204   :  { %1289 = vrcp.f32 %v546_v44  ;;  %vm554_vm5 = vmor %vm552_vm4, %vm553_vm3  ;;  %v573_v63 = vand.u32 2147483648, %v546_v44  ;;  %v571_v5 = vand.u32 2147483647, %v546_v44  ;;  %vm567_vm8 = vweird.f32 %v546_v44 }
 0x205   :  { %v549_v47 = vsub.f32 1.0, %v548_v45 }
 0x206   :  { %v574_v9 = vor.u32 1.1754944e-38, %v573_v63  ;;  %vm572_vm10 = vcmp.eq.f32.partialorder %v571_v5, 8.507059e+37 }
 0x207   :  { %v550_v50 = vmul.f32 %v1288_v43, %v549_v47 }
 0x209   :  { %v551_v53 = vadd.f32 %v1288_v43, %v550_v50  ;;  %v1684_v37 = vpop.f32.mrf.mxu2 }
 0x20a   :  { %v1290_v54 = vpop.eup %1289 }
 0x20b   :  { %v563_v57 = vmul.f32 %v1290_v54, %v546_v44  ;;  %v555_v59 = vsel %vm554_vm5, %v1288_v43, %v551_v53  ;;  %vm568_vm7 = vweird.f32 %v1290_v54 }
 0x20c   :  { %v560_v60 = vsel %vm557_vm6, %v559_v56, %v555_v59  ;;  %vm569_vm9 = vmor %vm567_vm8, %vm568_vm7 }
 0x20d   :  { %v564_v61 = vsub.f32 1.0, %v563_v57  ;;  %v578_v62 = vmul.f32 %v577_v55, %v560_v60 }
 0x20f   :  { %v565_v2 = vmul.f32 %v1290_v54, %v564_v61  ;;  %v579_v4 = vadd.f32 %v578_v62, %v184_v58 }
 0x211   :  { %1291 = vtanh.f32 %v579_v4  ;;  %v566_v7 = vadd.f32 %v1290_v54, %v565_v2  ;;  %v1688_v39 = vpop.f32.mrf.mxu2 }
 0x213   :  { %v570_v12 = vsel %vm569_vm9, %v1290_v54, %v566_v7 }
 0x214   :  { %v575_v8 = vsel %vm572_vm10, %v574_v9, %v570_v12  ;;  %v187_v9 = vadd.f32 %v186_v30, %v1553_v46 }
 0x215   :  { %v581_v20 = vsub.f32 1.0, %v575_v8  ;;  %v583_v28 = vmul.f32 %v575_v8, %v1619_v23  ;;  %v145_v23 = vpop.f32.mrf.mxu1 }
 0x216   :  { %v146_v47 = vadd.f32 %v145_v23, %v1539_v26 }
 0x217   :  { %v1292_v22 = vpop.eup %1291 }
 0x218   :  { %v582_v13 = vmul.f32 %v1292_v22, %v581_v20 }
 0x21a   :  { %v1654_v29 = vadd.f32 %v583_v28, %v582_v13 }
 0x21c   :  { %1235 = vmatmul.msk.f32.vlgmr.msrb.gmra.mxu1 %vm242_vm1, %v1654_v29  ;;  %1236 = vmatmul.msk.f32.vlgmr.msrb.gmra.mxu2 %vm242_vm1, %v1654_v29 }
 0x21d   :  { %1237 = vmatmul.msk.f32.vlgmr.msra.gmra.mxu3 %vm242_vm1, %v1654_v29  ;;  %871 = vmatpush.msrb.mxu1 %v1441_v10  ;;  %v1674_v31 = vpop.f32.mrf.mxu1 }
 0x21e   :  { %945 = vmatpush.msrb.mxu2 %v1397_v0  ;;  %965 = vmatpush.msra.mxu3 %v1446_v11 }
 0x21f   :  { %872 = vmatpush.msrb.mxu1 %v1468_v15 }
 0x220   :  { %946 = vmatpush.msrb.mxu2 %v1402_v1  ;;  %966 = vmatpush.msra.mxu3 %v1461_v14 }
 0x221   :  { %873 = vmatpush.msrb.mxu1 %v1480_v17 }
 0x222   :  { %947 = vmatpush.msrb.mxu2 %v1411_v3  ;;  %967 = vmatpush.msra.mxu3 %v1473_v16 }
 0x223   :  { %874 = vmatpush.msrb.mxu1 %v1494_v19 }
 0x224   :  { %948 = vmatpush.msrb.mxu2 %v1423_v6  ;;  %968 = vmatpush.msra.mxu3 %v1486_v18 }
 0x225   :  { %v1678_v34 = vpop.f32.mrf.mxu1 }
 0x22d   :  { %v1682_v36 = vpop.f32.mrf.mxu1 }
 0x235   :  { %v1686_v38 = vpop.f32.mrf.mxu1 }
 0x299   :  { %v608_v43 = vpop.f32.mrf.mxu1 }
 0x29a   :  { %v651_v44 = vadd.f32 %v608_v43, %v105_v42 }
 0x29c   :  { %v1238_v45 = vmul.f32 -1.442695, %v651_v44 }
 0x29e   :  { %1293 = vpow2.f32 %v1238_v45 }
 0x29f   :  { %v628_v48 = vpop.f32.mrf.mxu2 }
 0x2a0   :  { %v652_v49 = vadd.f32 %v628_v48, %v146_v47  ;;  %v648_v61 = vpop.f32.mrf.mxu3 }
 0x2a1   :  { %v691_v7 = vadd.f32 %v1551_v41, %v648_v61 }
 0x2a2   :  { %v1239_v50 = vmul.f32 -1.442695, %v652_v49 }
 0x2a4   :  { %v1294_v51 = vpop.eup %1293  ;;  %1295 = vpow2.f32 %v1239_v50 }
 0x2a5   :  { %v659_v52 = vadd.f32 1.0, %v1294_v51 }
 0x2a7   :  { %1297 = vrcp.f32 %v659_v52  ;;  %v672_v24 = vand.u32 2147483648, %v659_v52  ;;  %v670_v59 = vand.u32 2147483647, %v659_v52  ;;  %vm666_vm12 = vweird.f32 %v659_v52 }
 0x2a9   :  { %v673_v2 = vor.u32 1.1754944e-38, %v672_v24  ;;  %vm671_vm14 = vcmp.eq.f32.partialorder %v670_v59, 8.507059e+37 }
 0x2aa   :  { %v1296_v53 = vpop.eup %1295 }
 0x2ab   :  { %v660_v54 = vadd.f32 1.0, %v1296_v53 }
 0x2ad   :  { %v1298_v55 = vpop.eup %1297  ;;  %1299 = vrcp.f32 %v660_v54  ;;  %v687_v20 = vand.u32 2147483648, %v660_v54  ;;  %v685_v13 = vand.u32 2147483647, %v660_v54  ;;  %vm681_vm0 = vweird.f32 %v660_v54 }
 0x2ae   :  { %v662_v56 = vmul.f32 %v1298_v55, %v659_v52  ;;  %vm667_vm11 = vweird.f32 %v1298_v55 }
 0x2af   :  { %vm668_vm13 = vmor %vm666_vm12, %vm667_vm11  ;;  %v688_v42 = vor.u32 1.1754944e-38, %v687_v20  ;;  %vm686_vm3 = vcmp.eq.f32.partialorder %v685_v13, 8.507059e+37 }
 0x2b0   :  { %v663_v57 = vsub.f32 1.0, %v662_v56 }
 0x2b2   :  { %v664_v58 = vmul.f32 %v1298_v55, %v663_v57 }
 0x2b3   :  { %v1300_v60 = vpop.eup %1299 }
 0x2b4   :  { %v677_v62 = vmul.f32 %v1300_v60, %v660_v54  ;;  %v665_v63 = vadd.f32 %v1298_v55, %v664_v58  ;;  %vm682_vm15 = vweird.f32 %v1300_v60 }
 0x2b5   :  { %vm683_vm2 = vmor %vm681_vm0, %vm682_vm15 }
 0x2b6   :  { %v678_v4 = vsub.f32 1.0, %v677_v62  ;;  %v669_v5 = vsel %vm668_vm13, %v1298_v55, %v665_v63 }
 0x2b7   :  { %v674_v12 = vsel %vm671_vm14, %v673_v2, %v669_v5 }
 0x2b8   :  { %v679_v8 = vmul.f32 %v1300_v60, %v678_v4  ;;  %v692_v22 = vmul.f32 %v691_v7, %v674_v12  ;;  %v190_v7 = vadd.f32 %v1676_v32, %v1553_v46  ;;  %v152_v32 = vadd.f32 %v1678_v34, %v1539_v26 }
 0x2ba   :  { %v680_v28 = vadd.f32 %v1300_v60, %v679_v8  ;;  %v693_v23 = vadd.f32 %v692_v22, %v187_v9 }
 0x2bc   :  { %v684_v43 = vsel %vm683_vm2, %v1300_v60, %v680_v28  ;;  %1301 = vtanh.f32 %v693_v23 }
 0x2bd   :  { %v689_v44 = vsel %vm686_vm3, %v688_v42, %v684_v43 }
 0x2be   :  { %v695_v45 = vsub.f32 1.0, %v689_v44  ;;  %v697_v30 = vmul.f32 %v689_v44, %v1654_v29 }
 0x2c2   :  { %v1302_v47 = vpop.eup %1301 }
 0x2c3   :  { %v696_v48 = vmul.f32 %v1302_v47, %v695_v45 }
 0x2c5   :  { %v1696_v49 = vadd.f32 %v697_v30, %v696_v48 }
 0x2c7   :  { %1240 = vmatmul.msk.f32.vlgmr.msra.gmra.mxu0 %vm242_vm1, %v1696_v49  ;;  %1241 = vmatmul.msk.f32.vlgmr.msra.gmra.mxu1 %vm242_vm1, %v1696_v49 }
 0x2c8   :  { %1242 = vmatmul.msk.f32.vlgmr.msra.gmra.mxu2 %vm242_vm1, %v1696_v49  ;;  %985 = vmatpush.msra.mxu0 %v1441_v10 }
 0x2c9   :  { %1059 = vmatpush.msra.mxu1 %v1397_v0  ;;  %1079 = vmatpush.msra.mxu2 %v1446_v11  ;;  %v108_v0 = vadd.f32 %v1641_v25, %v1536_v21 }
 0x2ca   :  { %986 = vmatpush.msra.mxu0 %v1468_v15 }
 0x2cb   :  { %1060 = vmatpush.msra.mxu1 %v1402_v1  ;;  %1080 = vmatpush.msra.mxu2 %v1461_v14  ;;  %v149_v1 = vadd.f32 %v1674_v31, %v1539_v26 }
 0x2cc   :  { %987 = vmatpush.msra.mxu0 %v1480_v17 }
 0x2cd   :  { %1061 = vmatpush.msra.mxu1 %v1411_v3  ;;  %1081 = vmatpush.msra.mxu2 %v1473_v16 }
 0x2ce   :  { %988 = vmatpush.msra.mxu0 %v1494_v19 }
 0x2cf   :  { %1062 = vmatpush.msra.mxu1 %v1423_v6  ;;  %1082 = vmatpush.msra.mxu2 %v1486_v18 }
 0x344   :  { %v722_v11 = vpop.f32.mrf.mxu0  ;;  %v742_v14 = vpop.f32.mrf.mxu1 }
 0x345   :  { %v765_v29 = vadd.f32 %v722_v11, %v108_v0  ;;  %v766_v50 = vadd.f32 %v742_v14, %v149_v1 }
 0x347   :  { %v1243_v51 = vmul.f32 -1.442695, %v765_v29  ;;  %v1244_v3 = vmul.f32 -1.442695, %v766_v50 }
 0x349   :  { %1303 = vpow2.f32 %v1243_v51 }
 0x34a   :  { %1305 = vpow2.f32 %v1244_v3 }
 0x34b   :  { %v762_v60 = vpop.f32.mrf.mxu2 }
 0x34c   :  { %v805_v2 = vadd.f32 %v1551_v41, %v762_v60 }
 0x34f   :  { %v1304_v16 = vpop.eup %1303 }
 0x350   :  { %v1306_v52 = vpop.eup %1305  ;;  %v773_v53 = vadd.f32 1.0, %v1304_v16 }
 0x351   :  { %v774_v6 = vadd.f32 1.0, %v1306_v52 }
 0x352   :  { %1307 = vrcp.f32 %v773_v53  ;;  %v786_v57 = vand.u32 2147483648, %v773_v53  ;;  %v784_v58 = vand.u32 2147483647, %v773_v53  ;;  %vm780_vm5 = vweird.f32 %v773_v53 }
 0x353   :  { %1309 = vrcp.f32 %v774_v6  ;;  %v801_v9 = vand.u32 2147483648, %v774_v6  ;;  %vm795_vm9 = vweird.f32 %v774_v6  ;;  %v799_v8 = vand.u32 2147483647, %v774_v6 }
 0x354   :  { %v787_v62 = vor.u32 1.1754944e-38, %v786_v57  ;;  %vm785_vm7 = vcmp.eq.f32.partialorder %v784_v58, 8.507059e+37  ;;  %v193_v57 = vadd.f32 %v1680_v35, %v1553_v46  ;;  %v114_v35 = vadd.f32 %v1646_v33, %v1536_v21 }
 0x355   :  { %v802_v13 = vor.u32 1.1754944e-38, %v801_v9  ;;  %vm800_vm11 = vcmp.eq.f32.partialorder %v799_v8, 8.507059e+37 }
 0x358   :  { %v1308_v18 = vpop.eup %1307 }
 0x359   :  { %v1310_v54 = vpop.eup %1309  ;;  %v776_v25 = vmul.f32 %v1308_v18, %v773_v53  ;;  %vm781_vm4 = vweird.f32 %v1308_v18 }
 0x35a   :  { %v791_v55 = vmul.f32 %v1310_v54, %v774_v6  ;;  %vm782_vm6 = vmor %vm780_vm5, %vm781_vm4  ;;  %vm796_vm8 = vweird.f32 %v1310_v54 }
 0x35b   :  { %v777_v56 = vsub.f32 1.0, %v776_v25  ;;  %vm797_vm10 = vmor %vm795_vm9, %vm796_vm8 }
 0x35c   :  { %v792_v31 = vsub.f32 1.0, %v791_v55 }
 0x35d   :  { %v778_v24 = vmul.f32 %v1308_v18, %v777_v56 }
 0x35e   :  { %v793_v59 = vmul.f32 %v1310_v54, %v792_v31 }
 0x35f   :  { %v779_v61 = vadd.f32 %v1308_v18, %v778_v24 }
 0x360   :  { %v794_v4 = vadd.f32 %v1310_v54, %v793_v59 }
 0x361   :  { %v783_v63 = vsel %vm782_vm6, %v1308_v18, %v779_v61 }
 0x362   :  { %v788_v5 = vsel %vm785_vm7, %v787_v62, %v783_v63  ;;  %v798_v22 = vsel %vm797_vm10, %v1310_v54, %v794_v4 }
 0x363   :  { %v806_v12 = vmul.f32 %v805_v2, %v788_v5  ;;  %v803_v28 = vsel %vm800_vm11, %v802_v13, %v798_v22 }
 0x364   :  { %v809_v23 = vsub.f32 1.0, %v803_v28  ;;  %v811_v44 = vmul.f32 %v803_v28, %v1696_v49  ;;  %v111_v49 = vadd.f32 %v1643_v27, %v1536_v21 }
 0x365   :  { %v807_v20 = vadd.f32 %v806_v12, %v190_v7  ;;  %v155_v12 = vadd.f32 %v1682_v36, %v1539_v26 }
 0x367   :  { %1311 = vtanh.f32 %v807_v20 }
 0x36d   :  { %v1312_v42 = vpop.eup %1311 }
 0x36e   :  { %v810_v43 = vmul.f32 %v1312_v42, %v809_v23 }
 0x370   :  { %v812_v45 = vadd.f32 %v811_v44, %v810_v43 }
 0x372   :  { %1245 = vmatmul.msk.f32.vlgmr.msrb.gmra.mxu3 %vm242_vm1, %v812_v45  ;;  %1246 = vmatmul.msk.f32.vlgmr.msrb.gmra.mxu0 %vm242_vm1, %v812_v45 }
 0x373   :  { %1247 = vmatmul.msk.f32.vlgmr.msrb.gmra.mxu1 %vm242_vm1, %v812_v45  ;;  %1099 = vmatpush.msrb.mxu3 %v1441_v10 }
 0x375   :  { %1100 = vmatpush.msrb.mxu3 %v1468_v15 }
 0x377   :  { %1101 = vmatpush.msrb.mxu3 %v1480_v17 }
 0x379   :  { %1102 = vmatpush.msrb.mxu3 %v1494_v19 }
 0x3ef   :  { %v856_v47 = vpop.f32.mrf.mxu0 }
 0x3f0   :  { %v880_v48 = vadd.f32 %v856_v47, %v152_v32  ;;  %v876_v6 = vpop.f32.mrf.mxu1 }
 0x3f1   :  { %v919_v25 = vadd.f32 %v1551_v41, %v876_v6 }
 0x3f2   :  { %v1249_v30 = vmul.f32 -1.442695, %v880_v48 }
 0x3f4   :  { %1313 = vpow2.f32 %v1249_v30 }
 0x3f5   :  { %v836_v0 = vpop.f32.mrf.mxu3 }
 0x3f6   :  { %v879_v1 = vadd.f32 %v836_v0, %v111_v49 }
 0x3f8   :  { %v1248_v11 = vmul.f32 -1.442695, %v879_v1 }
 0x3fa   :  { %v1314_v10 = vpop.eup %1313  ;;  %1315 = vpow2.f32 %v1248_v11 }
 0x3fb   :  { %v888_v15 = vadd.f32 1.0, %v1314_v10 }
 0x3fd   :  { %1317 = vrcp.f32 %v888_v15  ;;  %v915_v24 = vand.u32 2147483648, %v888_v15  ;;  %vm909_vm2 = vweird.f32 %v888_v15  ;;  %v913_v59 = vand.u32 2147483647, %v888_v15 }
 0x3ff   :  { %v916_v62 = vor.u32 1.1754944e-38, %v915_v24  ;;  %vm914_vm4 = vcmp.eq.f32.partialorder %v913_v59, 8.507059e+37  ;;  %v158_v24 = vadd.f32 %v1686_v38, %v1539_v26  ;;  %v1155_v26 = vld [vmem:[%s1795_s6] sm:$0xff] }
 0x400   :  { %v1316_v17 = vpop.eup %1315 }
 0x401   :  { %v887_v14 = vadd.f32 1.0, %v1316_v17 }
 0x403   :  { %1319 = vrcp.f32 %v887_v14  ;;  %v1318_v19 = vpop.eup %1317  ;;  %v900_v16 = vand.u32 2147483648, %v887_v14  ;;  %v898_v27 = vand.u32 2147483647, %v887_v14  ;;  %vm894_vm13 = vweird.f32 %v887_v14 }
 0x404   :  { %v905_v29 = vmul.f32 %v1318_v19, %v888_v15  ;;  %vm910_vm0 = vweird.f32 %v1318_v19 }
 0x405   :  { %v901_v54 = vor.u32 1.1754944e-38, %v900_v16  ;;  %vm899_vm15 = vcmp.eq.f32.partialorder %v898_v27, 8.507059e+37  ;;  %vm911_vm3 = vmor %vm909_vm2, %vm910_vm0 }
 0x406   :  { %v906_v51 = vsub.f32 1.0, %v905_v29 }
 0x408   :  { %v907_v53 = vmul.f32 %v1318_v19, %v906_v51 }
 0x409   :  { %v1320_v34 = vpop.eup %1319 }
 0x40a   :  { %v890_v50 = vmul.f32 %v1320_v34, %v887_v14  ;;  %vm895_vm12 = vweird.f32 %v1320_v34  ;;  %v908_v56 = vadd.f32 %v1318_v19, %v907_v53 }
 0x40b   :  { %vm896_vm14 = vmor %vm894_vm13, %vm895_vm12 }
 0x40c   :  { %v891_v3 = vsub.f32 1.0, %v890_v50  ;;  %v912_v61 = vsel %vm911_vm3, %v1318_v19, %v908_v56  ;;  %v196_v50 = vadd.f32 %v1684_v37, %v1553_v46  ;;  %v117_v37 = vadd.f32 %v1649_v40, %v1536_v21  ;;  %v1156_v21 = vld [vmem:[%s1795_s6 + $0x8] sm:$0xff] }
 0x40d   :  { %v917_v63 = vsel %vm914_vm4, %v916_v62, %v912_v61  ;;  %v1157_v62 = vld [vmem:[%s1795_s6 + $0x10] sm:$0xff] }
 0x40e   :  { %v892_v52 = vmul.f32 %v1320_v34, %v891_v3  ;;  %v923_v2 = vsub.f32 1.0, %v917_v63  ;;  %v925_v7 = vmul.f32 %v917_v63, %v812_v45 }
 0x410   :  { %v893_v18 = vadd.f32 %v1320_v34, %v892_v52 }
 0x412   :  { %v897_v55 = vsel %vm896_vm14, %v1320_v34, %v893_v18 }
 0x413   :  { %v902_v31 = vsel %vm899_vm15, %v901_v54, %v897_v55 }
 0x414   :  { %v920_v58 = vmul.f32 %v919_v25, %v902_v31 }
 0x416   :  { %v921_v60 = vadd.f32 %v920_v58, %v193_v57 }
 0x418   :  { %1321 = vtanh.f32 %v921_v60  ;;  %v1158_v60 = vld [vmem:[%s1795_s6 + $0x18] sm:$0xff] }
 0x419   :  { %1178 = vmatpush.msrb.mxu0 %v1158_v60 }
 0x41b   :  { %1179 = vmatpush.msrb.mxu0 %v1157_v62 }
 0x41d   :  { %1180 = vmatpush.msrb.mxu0 %v1156_v21 }
 0x41e   :  { %v1322_v4 = vpop.eup %1321 }
 0x41f   :  { %v924_v5 = vmul.f32 %v1322_v4, %v923_v2  ;;  %1181 = vmatpush.msrb.mxu0 %v1155_v26 }
 0x421   :  { %v926_v9 = vadd.f32 %v925_v7, %v924_v5 }
 0x423   :  { %1250 = vmatmul.msk.f32.vlgmr.msrb.gmra.mxu2 %vm242_vm1, %v926_v9  ;;  %1251 = vmatmul.msk.f32.vlgmr.msra.gmra.mxu3 %vm242_vm1, %v926_v9 }
 0x424   :  { %1252 = vmatmul.msk.f32.vlgmr.msra.gmra.mxu0 %vm242_vm1, %v926_v9 }
 0x4a1   :  { %v990_v11 = vpop.f32.mrf.mxu0 }
 0x4a2   :  { %v1033_v14 = vadd.f32 %v1551_v41, %v990_v11 }
 0x4a6   :  { %v950_v8 = vpop.f32.mrf.mxu2  ;;  %v970_v20 = vpop.f32.mrf.mxu3 }
 0x4a7   :  { %v993_v22 = vadd.f32 %v950_v8, %v114_v35  ;;  %v994_v13 = vadd.f32 %v970_v20, %v155_v12 }
 0x4a9   :  { %v1253_v28 = vmul.f32 -1.442695, %v993_v22  ;;  %v1254_v23 = vmul.f32 -1.442695, %v994_v13 }
 0x4ab   :  { %1323 = vpow2.f32 %v1253_v28 }
 0x4ac   :  { %1325 = vpow2.f32 %v1254_v23 }
 0x4b1   :  { %v1324_v42 = vpop.eup %1323 }
 0x4b2   :  { %v1326_v43 = vpop.eup %1325  ;;  %v1001_v44 = vadd.f32 1.0, %v1324_v42 }
 0x4b3   :  { %v1002_v45 = vadd.f32 1.0, %v1326_v43  ;;  %v1343_v43 = vld [vmem:[%s1792_s5] ss:$0 sm:$0xff] }
 0x4b4   :  { %1327 = vrcp.f32 %v1001_v44  ;;  %v1014_v36 = vand.u32 2147483648, %v1001_v44  ;;  %v1012_v1 = vand.u32 2147483647, %v1001_v44  ;;  %vm1008_vm6 = vweird.f32 %v1001_v44 }
 0x4b5   :  { %1329 = vrcp.f32 %v1002_v45  ;;  %v1029_v3 = vand.u32 2147483648, %v1002_v45  ;;  %vm1023_vm10 = vweird.f32 %v1002_v45  ;;  %v1027_v16 = vand.u32 2147483647, %v1002_v45 }
 0x4b6   :  { %v1015_v17 = vor.u32 1.1754944e-38, %v1014_v36  ;;  %vm1013_vm8 = vcmp.eq.f32.partialorder %v1012_v1, 8.507059e+37 }
 0x4b7   :  { %v1030_v53 = vor.u32 1.1754944e-38, %v1029_v3  ;;  %vm1028_vm12 = vcmp.eq.f32.partialorder %v1027_v16, 8.507059e+37 }
 0x4ba   :  { %v1328_v32 = vpop.eup %1327 }
 0x4bb   :  { %v1330_v47 = vpop.eup %1329  ;;  %v1004_v33 = vmul.f32 %v1328_v32, %v1001_v44  ;;  %vm1009_vm5 = vweird.f32 %v1328_v32 }
 0x4bc   :  { %v1019_v48 = vmul.f32 %v1330_v47, %v1002_v45  ;;  %vm1010_vm7 = vmor %vm1008_vm6, %vm1009_vm5  ;;  %vm1024_vm9 = vweird.f32 %v1330_v47  ;;  %v199_v45 = vadd.f32 %v1688_v39, %v1553_v46 }
 0x4bd   :  { %v1005_v30 = vsub.f32 1.0, %v1004_v33  ;;  %vm1025_vm11 = vmor %vm1023_vm10, %vm1024_vm9 }
 0x4be   :  { %v1020_v49 = vsub.f32 1.0, %v1019_v48 }
 0x4bf   :  { %v1006_v0 = vmul.f32 %v1328_v32, %v1005_v30 }
 0x4c0   :  { %v1021_v10 = vmul.f32 %v1330_v47, %v1020_v49 }
 0x4c1   :  { %v1007_v15 = vadd.f32 %v1328_v32, %v1006_v0 }
 0x4c2   :  { %v1022_v34 = vadd.f32 %v1330_v47, %v1021_v10 }
 0x4c3   :  { %v1011_v19 = vsel %vm1010_vm7, %v1328_v32, %v1007_v15 }
 0x4c4   :  { %v1016_v29 = vsel %vm1013_vm8, %v1015_v17, %v1011_v19  ;;  %v1026_v27 = vsel %vm1025_vm11, %v1330_v47, %v1022_v34 }
 0x4c5   :  { %v1034_v51 = vmul.f32 %v1033_v14, %v1016_v29  ;;  %v1031_v6 = vsel %vm1028_vm12, %v1030_v53, %v1026_v27  ;;  %v1262_v14 = vld [vmem:[%s1794_s7] ss:$0 sm:$0xff] }
 0x4c6   :  { %v1037_v41 = vsub.f32 1.0, %v1031_v6  ;;  %v1039_v25 = vmul.f32 %v1031_v6, %v926_v9 }
 0x4c7   :  { %v1035_v52 = vadd.f32 %v1034_v51, %v196_v50 }
 0x4c9   :  { %1331 = vtanh.f32 %v1035_v52 }
 0x4cf   :  { %v1332_v18 = vpop.eup %1331 }
 0x4d0   :  { %v1038_v54 = vmul.f32 %v1332_v18, %v1037_v41 }
 0x4d2   :  { %v1748_v55 = vadd.f32 %v1039_v25, %v1038_v54 }
 0x4d4   :  { %1255 = vmatmul.msk.f32.vlgmr.msra.gmra.mxu1 %vm242_vm1, %v1748_v55  ;;  %1256 = vmatmul.msk.f32.vlgmr.msra.gmra.mxu2 %vm242_vm1, %v1748_v55 }
 0x4d5   :  { %1257 = vmatmul.msk.f32.vlgmr.msrb.gmra.mxu3 %vm242_vm1, %v1748_v55 }
 0x551   :  { %v1064_v56 = vpop.f32.mrf.mxu1 }
 0x552   :  { %v1107_v31 = vadd.f32 %v1064_v56, %v117_v37 }
 0x554   :  { %v1258_v57 = vmul.f32 -1.442695, %v1107_v31 }
 0x556   :  { %1333 = vpow2.f32 %v1258_v57 }
 0x557   :  { %v1084_v58 = vpop.f32.mrf.mxu2 }
 0x558   :  { %v1108_v59 = vadd.f32 %v1084_v58, %v158_v24  ;;  %v1104_v20 = vpop.f32.mrf.mxu3 }
 0x559   :  { %v1147_v44 = vadd.f32 %v1343_v43, %v1104_v20 }
 0x55a   :  { %v1259_v61 = vmul.f32 -1.442695, %v1108_v59 }
 0x55c   :  { %v1334_v40 = vpop.eup %1333  ;;  %1335 = vpow2.f32 %v1259_v61 }
 0x55d   :  { %v1115_v38 = vadd.f32 1.0, %v1334_v40 }
 0x55f   :  { %1337 = vrcp.f32 %v1115_v38  ;;  %v1128_v9 = vand.u32 2147483648, %v1115_v38  ;;  %v1126_v12 = vand.u32 2147483647, %v1115_v38  ;;  %vm1122_vm14 = vweird.f32 %v1115_v38 }
 0x561   :  { %v1129_v28 = vor.u32 1.1754944e-38, %v1128_v9  ;;  %vm1127_vm0 = vcmp.eq.f32.partialorder %v1126_v12, 8.507059e+37 }
 0x562   :  { %v1336_v63 = vpop.eup %1335 }
 0x563   :  { %v1116_v2 = vadd.f32 1.0, %v1336_v63 }
 0x565   :  { %v1338_v4 = vpop.eup %1337  ;;  %1339 = vrcp.f32 %v1116_v2  ;;  %v1143_v33 = vand.u32 2147483648, %v1116_v2  ;;  %v1141_v30 = vand.u32 2147483647, %v1116_v2  ;;  %vm1137_vm3 = vweird.f32 %v1116_v2 }
 0x566   :  { %v1118_v5 = vmul.f32 %v1338_v4, %v1115_v38  ;;  %vm1123_vm13 = vweird.f32 %v1338_v4 }
 0x567   :  { %vm1124_vm15 = vmor %vm1122_vm14, %vm1123_vm13  ;;  %v1144_v0 = vor.u32 1.1754944e-38, %v1143_v33  ;;  %vm1142_vm5 = vcmp.eq.f32.partialorder %v1141_v30, 8.507059e+37 }
 0x568   :  { %v1119_v7 = vsub.f32 1.0, %v1118_v5 }
 0x56a   :  { %v1120_v35 = vmul.f32 %v1338_v4, %v1119_v7 }
 0x56b   :  { %v1340_v8 = vpop.eup %1339 }
 0x56c   :  { %v1133_v22 = vmul.f32 %v1340_v8, %v1116_v2  ;;  %v1121_v13 = vadd.f32 %v1338_v4, %v1120_v35  ;;  %vm1138_vm2 = vweird.f32 %v1340_v8 }
 0x56d   :  { %vm1139_vm4 = vmor %vm1137_vm3, %vm1138_vm2 }
 0x56e   :  { %v1134_v23 = vsub.f32 1.0, %v1133_v22  ;;  %v1125_v42 = vsel %vm1124_vm15, %v1338_v4, %v1121_v13 }
 0x56f   :  { %v1130_v32 = vsel %vm1127_vm0, %v1129_v28, %v1125_v42 }
 0x570   :  { %v1135_v47 = vmul.f32 %v1340_v8, %v1134_v23  ;;  %v1148_v48 = vmul.f32 %v1147_v44, %v1130_v32 }
 0x572   :  { %v1136_v36 = vadd.f32 %v1340_v8, %v1135_v47  ;;  %v1149_v49 = vadd.f32 %v1148_v48, %v199_v45 }
 0x574   :  { %v1140_v1 = vsel %vm1139_vm4, %v1340_v8, %v1136_v36  ;;  %1341 = vtanh.f32 %v1149_v49 }
 0x575   :  { %v1145_v11 = vsel %vm1142_vm5, %v1144_v0, %v1140_v1 }
 0x576   :  { %v1151_v10 = vsub.f32 1.0, %v1145_v11  ;;  %v1153_v46 = vmul.f32 %v1145_v11, %v1748_v55 }
 0x57a   :  { %v1342_v15 = vpop.eup %1341 }
 0x57b   :  { %v1152_v17 = vmul.f32 %v1342_v15, %v1151_v10 }
 0x57d   :  { %v1154_v39 = vadd.f32 %v1153_v46, %v1152_v17 }
 0x57f   :  { %1260 = vmatmul.msk.f32.vlgmr.msrb.gmra.mxu0 %vm242_vm1, %v1154_v39  ;;  %1187 = vst [vmem:[%s1796_s9] sm:$0xff] %v1154_v39 }
 0x5fc   :  { %v1183_v19 = vpop.f32.mrf.mxu0 }
 0x5fd   :  { %v1184_v29 = vadd.f32 %v1262_v14, %v1183_v19 }
 0x5ff   :  { %1186 = vst [vmem:[%s1797_s8] sm:$0xff] %v1184_v29 }

</bundles_post_ra>
